<compile_context>
chip_gen: v6e
topology: v6e:2x2x1
jax: 0.10.0
libtpu: 0.0.40
codegen_flags: <defaults>
</compile_context>

<pallas_src>
import functools

import jax
import jax.numpy as jnp
import numpy as np
from jax.experimental import pallas as pl
from jax.experimental.pallas import tpu as pltpu


def _conv3x3_kernel(x_ref, w_ref, b_ref, o_ref, *, W):
    """One batch element of a 3x3 / stride-1 / pad-1 conv (cross-correlation).

    x_ref: (1, C_in, H*W + 2*W + 2)  zero-padded input, spatial flat on lanes
    w_ref: (9, C_out, C_in)          tap-major weights, tap = 3*kh + kw
    b_ref: (C_out, 1)
    o_ref: (1, C_out, H*W)
    """
    C_out, HW = o_ref.shape[1], o_ref.shape[2]

    # Column index of every output pixel; used to mask the taps that would
    # otherwise wrap across a row boundary in the flattened layout. Hoisted
    # out of the tap loop.
    col = jax.lax.broadcasted_iota(jnp.int32, (1, HW), 1) % W
    not_first_col = col != 0          # needed for kw == 0 (left neighbor)
    not_last_col = col != (W - 1)     # needed for kw == 2 (right neighbor)

    acc = jnp.zeros((C_out, HW), jnp.float32)
    for kh in range(3):
        for kw in range(3):
            # Input pixel (h+kh-1, w+kw-1) of output pixel p = h*W + w lives
            # at flat index p + (W+1) + (kh-1)*W + (kw-1) in the padded input
            # (row over/underflow lands in the zero pad; column wrap is
            # masked below).  `s` is a static Python int -> static slice.
            s = (W + 1) + (kh - 1) * W + (kw - 1)
            xs = x_ref[0, :, s:s + HW]                        # (C_in, HW)
            y = jnp.dot(w_ref[3 * kh + kw], xs,
                        preferred_element_type=jnp.float32)   # (C_out, HW)
            if kw == 0:
                y = jnp.where(not_first_col, y, 0.0)
            elif kw == 2:
                y = jnp.where(not_last_col, y, 0.0)
            acc = acc + y

    o_ref[0] = (acc + b_ref[...]).astype(o_ref.dtype)


def conv3x3_same_pallas(x_nchw, weight, bias):
    """Conv2d(C_in, C_out, kernel_size=3, stride=1, padding=1) forward.

    x_nchw: (N, C_in, H, W) f32, weight: (C_out, C_in, 3, 3), bias: (C_out,)
    returns (N, C_out, H, W) f32  (matches torch.nn.Conv2d semantics).
    """
    N, C_in, H, W = x_nchw.shape
    C_out = weight.shape[0]
    HW = H * W
    FLAT = HW + 2 * W + 2

    # Layout glue (no activation transposes): flatten spatial onto the lane
    # axis and zero-pad by W+1 on each side so every 3x3 tap is a static
    # in-kernel slice and the conv's zero padding falls into the pad region.
    x_flat = x_nchw.reshape(N, C_in, HW)
    x_pad = jnp.pad(x_flat, ((0, 0), (0, 0), (W + 1, W + 1)))

    # (C_out, C_in, 3, 3) -> (9, C_out, C_in); tiny, stays resident in VMEM.
    w_taps = jnp.transpose(weight, (2, 3, 0, 1)).reshape(9, C_out, C_in)
    b_col = bias.reshape(C_out, 1)

    kernel = functools.partial(_conv3x3_kernel, W=W)

    out_flat = pl.pallas_call(
        kernel,
        out_shape=jax.ShapeDtypeStruct((N, C_out, HW), x_nchw.dtype),
        grid_spec=pltpu.PrefetchScalarGridSpec(
            num_scalar_prefetch=0,
            grid=(N,),
            in_specs=[
                pl.BlockSpec((1, C_in, FLAT), lambda n: (n, 0, 0)),
                pl.BlockSpec((9, C_out, C_in), lambda n: (0, 0, 0)),
                pl.BlockSpec((C_out, 1), lambda n: (0, 0)),
            ],
            out_specs=pl.BlockSpec((1, C_out, HW), lambda n: (n, 0, 0)),
        ),
        compiler_params=pltpu.CompilerParams(
            dimension_semantics=("parallel",),
        ),
    )(x_pad, w_taps, b_col)

    return out_flat.reshape(N, C_out, H, W)


def scalarnet_forward(x, scalar, params):
    """ScalarNet.forward: identity(scalar) is a no-op; the `scalar == 5`
    branch is plain Python control flow on a host float, exactly as in the
    PyTorch module."""
    if scalar == 5:
        return conv3x3_same_pallas(x, params["conv1_w"], params["conv1_b"])
    else:
        return conv3x3_same_pallas(x, params["conv2_w"], params["conv2_b"])


def _conv_ref(x, w, b):
    y = jax.lax.conv_general_dilated(
        x, w, window_strides=(1, 1), padding=((1, 1), (1, 1)),
        dimension_numbers=("NCHW", "OIHW", "NCHW"),
        precision=jax.lax.Precision.HIGHEST)
    return y + b[None, :, None, None]


if __name__ == "__main__":
    # Small shapes consistent with the module: channels are fixed at 64 by
    # the conv definitions; batch=2, spatial=16.
    N, C_in, H, W = 2, 64, 16, 16

    key = jax.random.PRNGKey(0)
    kx, kw1, kb1, kw2, kb2 = jax.random.split(key, 5)

    x = jax.random.normal(kx, (N, C_in, H, W), dtype=jnp.float32)

    fan_in = C_in * 3 * 3
    bound = 1.0 / np.sqrt(fan_in)
    params = {
        "conv1_w": jax.random.uniform(kw1, (64, C_in, 3, 3), jnp.float32,
                                      minval=-bound, maxval=bound),
        "conv1_b": jax.random.uniform(kb1, (64,), jnp.float32,
                                      minval=-bound, maxval=bound),
        "conv2_w": jax.random.uniform(kw2, (32, C_in, 3, 3), jnp.float32,
                                      minval=-bound, maxval=bound),
        "conv2_b": jax.random.uniform(kb2, (32,), jnp.float32,
                                      minval=-bound, maxval=bound),
    }

    # scalar == 5 -> conv1 branch (64 -> 64)
    out1 = scalarnet_forward(x, 5.0, params)
    jax.block_until_ready(out1)
    ref1 = _conv_ref(x, params["conv1_w"], params["conv1_b"])
    np.testing.assert_allclose(np.asarray(out1), np.asarray(ref1),
                               rtol=1e-4, atol=1e-4)

    # any other scalar -> conv2 branch (64 -> 32)
    out2 = scalarnet_forward(x, 3.0, params)
    jax.block_until_ready(out2)
    ref2 = _conv_ref(x, params["conv2_w"], params["conv2_b"])
    np.testing.assert_allclose(np.asarray(out2), np.asarray(ref2),
                               rtol=1e-4, atol=1e-4)

    print("KERNEL_OK")
</pallas_src>

<mosaic_0001>
module attributes {stable_mosaic.version = 11 : i64} {
  func.func @_conv3x3_kernel(%arg0: i32, %arg1: memref<1x64x290xf32, #tpu.memory_space<vmem>>, %arg2: memref<9x64x64xf32, #tpu.memory_space<vmem>>, %arg3: memref<64x1xf32, #tpu.memory_space<vmem>>, %arg4: memref<1x64x256xf32, #tpu.memory_space<vmem>>) attributes {dimension_semantics = [#tpu.dimension_semantics<parallel>], iteration_bounds = array<i64: 2>, scalar_prefetch = 0 : i64, scratch_operands = 0 : i64, tpu.core_type = #tpu.core_type<tc>, window_params = [{transform_indices = @transform_0, window_bounds = array<i64: 1, 64, 290>}, {pipeline_mode = #tpu.pipeline_mode<synchronous>, transform_indices = @transform_1, window_bounds = array<i64: 9, 64, 64>}, {pipeline_mode = #tpu.pipeline_mode<synchronous>, transform_indices = @transform_2, window_bounds = array<i64: 64, 1>}, {transform_indices = @transform_3, window_bounds = array<i64: 1, 64, 256>}]} {
    %0 = tpu.iota {dimensions = array<i32: 1>} : vector<1x256xi32>
    %c16_i32 = arith.constant 16 : i32
    %c0_i32 = arith.constant 0 : i32
    %1 = arith.cmpi eq, %c16_i32, %c0_i32 : i32
    %c1_i32 = arith.constant 1 : i32
    %2 = arith.select %1, %c1_i32, %c16_i32 : i32
    %3 = vector.broadcast %2 : i32 to vector<1x256xi32>
    %4 = arith.remsi %0, %3 : vector<1x256xi32>
    %c0_i32_0 = arith.constant 0 : i32
    %5 = vector.broadcast %c0_i32_0 : i32 to vector<1x256xi32>
    %6 = arith.cmpi ne, %4, %5 : vector<1x256xi32>
    %c0_i32_1 = arith.constant 0 : i32
    %7 = vector.broadcast %c0_i32_1 : i32 to vector<1x256xi32>
    %8 = arith.cmpi slt, %4, %7 : vector<1x256xi32>
    %c0_i32_2 = arith.constant 0 : i32
    %9 = arith.cmpi slt, %2, %c0_i32_2 : i32
    %10 = vector.broadcast %9 : i1 to vector<1x256xi1>
    %11 = vector.broadcast %10 : vector<1x256xi1> to vector<1x256xi1>
    %12 = arith.xori %8, %11 : vector<1x256xi1>
    %13 = arith.andi %12, %6 : vector<1x256xi1>
    %14 = vector.broadcast %2 : i32 to vector<1x256xi32>
    %15 = arith.addi %4, %14 : vector<1x256xi32>
    %16 = arith.select %13, %15, %4 : vector<1x256xi1>, vector<1x256xi32>
    %c0_i32_3 = arith.constant 0 : i32
    %17 = vector.broadcast %c0_i32_3 : i32 to vector<1x256xi32>
    %18 = arith.cmpi ne, %16, %17 : vector<1x256xi32>
    %c15_i32 = arith.constant 15 : i32
    %19 = vector.broadcast %c15_i32 : i32 to vector<1x256xi32>
    %20 = arith.cmpi ne, %16, %19 : vector<1x256xi32>
    %cst = arith.constant 0.000000e+00 : f32
    %21 = vector.broadcast %cst : f32 to vector<64x256xf32>
    %c0 = arith.constant 0 : index
    %c0_4 = arith.constant 0 : index
    %c0_5 = arith.constant 0 : index
    %22 = vector.load %arg1[%c0, %c0_4, %c0_5] : memref<1x64x290xf32, #tpu.memory_space<vmem>>, vector<1x64x256xf32>
    %23 = vector.shape_cast %22 : vector<1x64x256xf32> to vector<64x256xf32>
    %c0_6 = arith.constant 0 : index
    %c0_7 = arith.constant 0 : index
    %c0_8 = arith.constant 0 : index
    %24 = vector.load %arg2[%c0_6, %c0_7, %c0_8] : memref<9x64x64xf32, #tpu.memory_space<vmem>>, vector<1x64x64xf32>
    %25 = vector.shape_cast %24 : vector<1x64x64xf32> to vector<64x64xf32>
    %cst_9 = arith.constant dense<0.000000e+00> : vector<64x256xf32>
    %26 = tpu.matmul %25, %23, %cst_9 {dimension_numbers = #tpu.dot_dimension_numbers<[1], [0], [0], [1], [0, 0, 1, 1], [], []>} : vector<64x64xf32>, vector<64x256xf32>, vector<64x256xf32> -> vector<64x256xf32>
    %cst_10 = arith.constant 0.000000e+00 : f32
    %27 = vector.shape_cast %18 : vector<1x256xi1> to vector<1x256xi1>
    %28 = vector.broadcast %27 : vector<1x256xi1> to vector<64x256xi1>
    %29 = vector.broadcast %cst_10 : f32 to vector<64x256xf32>
    %30 = arith.select %28, %26, %29 : vector<64x256xi1>, vector<64x256xf32>
    %31 = arith.addf %21, %30 : vector<64x256xf32>
    %c0_11 = arith.constant 0 : index
    %c0_12 = arith.constant 0 : index
    %c1 = arith.constant 1 : index
    %32 = vector.load %arg1[%c0_11, %c0_12, %c1] : memref<1x64x290xf32, #tpu.memory_space<vmem>>, vector<1x64x256xf32>
    %33 = vector.shape_cast %32 : vector<1x64x256xf32> to vector<64x256xf32>
    %c1_13 = arith.constant 1 : index
    %c0_14 = arith.constant 0 : index
    %c0_15 = arith.constant 0 : index
    %34 = vector.load %arg2[%c1_13, %c0_14, %c0_15] : memref<9x64x64xf32, #tpu.memory_space<vmem>>, vector<1x64x64xf32>
    %35 = vector.shape_cast %34 : vector<1x64x64xf32> to vector<64x64xf32>
    %cst_16 = arith.constant dense<0.000000e+00> : vector<64x256xf32>
    %36 = tpu.matmul %35, %33, %cst_16 {dimension_numbers = #tpu.dot_dimension_numbers<[1], [0], [0], [1], [0, 0, 1, 1], [], []>} : vector<64x64xf32>, vector<64x256xf32>, vector<64x256xf32> -> vector<64x256xf32>
    %37 = arith.addf %31, %36 : vector<64x256xf32>
    %c0_17 = arith.constant 0 : index
    %c0_18 = arith.constant 0 : index
    %c2 = arith.constant 2 : index
    %38 = vector.load %arg1[%c0_17, %c0_18, %c2] : memref<1x64x290xf32, #tpu.memory_space<vmem>>, vector<1x64x256xf32>
    %39 = vector.shape_cast %38 : vector<1x64x256xf32> to vector<64x256xf32>
    %c2_19 = arith.constant 2 : index
    %c0_20 = arith.constant 0 : index
    %c0_21 = arith.constant 0 : index
    %40 = vector.load %arg2[%c2_19, %c0_20, %c0_21] : memref<9x64x64xf32, #tpu.memory_space<vmem>>, vector<1x64x64xf32>
    %41 = vector.shape_cast %40 : vector<1x64x64xf32> to vector<64x64xf32>
    %cst_22 = arith.constant dense<0.000000e+00> : vector<64x256xf32>
    %42 = tpu.matmul %41, %39, %cst_22 {dimension_numbers = #tpu.dot_dimension_numbers<[1], [0], [0], [1], [0, 0, 1, 1], [], []>} : vector<64x64xf32>, vector<64x256xf32>, vector<64x256xf32> -> vector<64x256xf32>
    %cst_23 = arith.constant 0.000000e+00 : f32
    %43 = vector.shape_cast %20 : vector<1x256xi1> to vector<1x256xi1>
    %44 = vector.broadcast %43 : vector<1x256xi1> to vector<64x256xi1>
    %45 = vector.broadcast %cst_23 : f32 to vector<64x256xf32>
    %46 = arith.select %44, %42, %45 : vector<64x256xi1>, vector<64x256xf32>
    %47 = arith.addf %37, %46 : vector<64x256xf32>
    %c0_24 = arith.constant 0 : index
    %c0_25 = arith.constant 0 : index
    %c16 = arith.constant 16 : index
    %48 = vector.load %arg1[%c0_24, %c0_25, %c16] : memref<1x64x290xf32, #tpu.memory_space<vmem>>, vector<1x64x256xf32>
    %49 = vector.shape_cast %48 : vector<1x64x256xf32> to vector<64x256xf32>
    %c3 = arith.constant 3 : index
    %c0_26 = arith.constant 0 : index
    %c0_27 = arith.constant 0 : index
    %50 = vector.load %arg2[%c3, %c0_26, %c0_27] : memref<9x64x64xf32, #tpu.memory_space<vmem>>, vector<1x64x64xf32>
    %51 = vector.shape_cast %50 : vector<1x64x64xf32> to vector<64x64xf32>
    %cst_28 = arith.constant dense<0.000000e+00> : vector<64x256xf32>
    %52 = tpu.matmul %51, %49, %cst_28 {dimension_numbers = #tpu.dot_dimension_numbers<[1], [0], [0], [1], [0, 0, 1, 1], [], []>} : vector<64x64xf32>, vector<64x256xf32>, vector<64x256xf32> -> vector<64x256xf32>
    %cst_29 = arith.constant 0.000000e+00 : f32
    %53 = vector.shape_cast %18 : vector<1x256xi1> to vector<1x256xi1>
    %54 = vector.broadcast %53 : vector<1x256xi1> to vector<64x256xi1>
    %55 = vector.broadcast %cst_29 : f32 to vector<64x256xf32>
    %56 = arith.select %54, %52, %55 : vector<64x256xi1>, vector<64x256xf32>
    %57 = arith.addf %47, %56 : vector<64x256xf32>
    %c0_30 = arith.constant 0 : index
    %c0_31 = arith.constant 0 : index
    %c17 = arith.constant 17 : index
    %58 = vector.load %arg1[%c0_30, %c0_31, %c17] : memref<1x64x290xf32, #tpu.memory_space<vmem>>, vector<1x64x256xf32>
    %59 = vector.shape_cast %58 : vector<1x64x256xf32> to vector<64x256xf32>
    %c4 = arith.constant 4 : index
    %c0_32 = arith.constant 0 : index
    %c0_33 = arith.constant 0 : index
    %60 = vector.load %arg2[%c4, %c0_32, %c0_33] : memref<9x64x64xf32, #tpu.memory_space<vmem>>, vector<1x64x64xf32>
    %61 = vector.shape_cast %60 : vector<1x64x64xf32> to vector<64x64xf32>
    %cst_34 = arith.constant dense<0.000000e+00> : vector<64x256xf32>
    %62 = tpu.matmul %61, %59, %cst_34 {dimension_numbers = #tpu.dot_dimension_numbers<[1], [0], [0], [1], [0, 0, 1, 1], [], []>} : vector<64x64xf32>, vector<64x256xf32>, vector<64x256xf32> -> vector<64x256xf32>
    %63 = arith.addf %57, %62 : vector<64x256xf32>
    %c0_35 = arith.constant 0 : index
    %c0_36 = arith.constant 0 : index
    %c18 = arith.constant 18 : index
    %64 = vector.load %arg1[%c0_35, %c0_36, %c18] : memref<1x64x290xf32, #tpu.memory_space<vmem>>, vector<1x64x256xf32>
    %65 = vector.shape_cast %64 : vector<1x64x256xf32> to vector<64x256xf32>
    %c5 = arith.constant 5 : index
    %c0_37 = arith.constant 0 : index
    %c0_38 = arith.constant 0 : index
    %66 = vector.load %arg2[%c5, %c0_37, %c0_38] : memref<9x64x64xf32, #tpu.memory_space<vmem>>, vector<1x64x64xf32>
    %67 = vector.shape_cast %66 : vector<1x64x64xf32> to vector<64x64xf32>
    %cst_39 = arith.constant dense<0.000000e+00> : vector<64x256xf32>
    %68 = tpu.matmul %67, %65, %cst_39 {dimension_numbers = #tpu.dot_dimension_numbers<[1], [0], [0], [1], [0, 0, 1, 1], [], []>} : vector<64x64xf32>, vector<64x256xf32>, vector<64x256xf32> -> vector<64x256xf32>
    %cst_40 = arith.constant 0.000000e+00 : f32
    %69 = vector.shape_cast %20 : vector<1x256xi1> to vector<1x256xi1>
    %70 = vector.broadcast %69 : vector<1x256xi1> to vector<64x256xi1>
    %71 = vector.broadcast %cst_40 : f32 to vector<64x256xf32>
    %72 = arith.select %70, %68, %71 : vector<64x256xi1>, vector<64x256xf32>
    %73 = arith.addf %63, %72 : vector<64x256xf32>
    %c0_41 = arith.constant 0 : index
    %c0_42 = arith.constant 0 : index
    %c32 = arith.constant 32 : index
    %74 = vector.load %arg1[%c0_41, %c0_42, %c32] : memref<1x64x290xf32, #tpu.memory_space<vmem>>, vector<1x64x256xf32>
    %75 = vector.shape_cast %74 : vector<1x64x256xf32> to vector<64x256xf32>
    %c6 = arith.constant 6 : index
    %c0_43 = arith.constant 0 : index
    %c0_44 = arith.constant 0 : index
    %76 = vector.load %arg2[%c6, %c0_43, %c0_44] : memref<9x64x64xf32, #tpu.memory_space<vmem>>, vector<1x64x64xf32>
    %77 = vector.shape_cast %76 : vector<1x64x64xf32> to vector<64x64xf32>
    %cst_45 = arith.constant dense<0.000000e+00> : vector<64x256xf32>
    %78 = tpu.matmul %77, %75, %cst_45 {dimension_numbers = #tpu.dot_dimension_numbers<[1], [0], [0], [1], [0, 0, 1, 1], [], []>} : vector<64x64xf32>, vector<64x256xf32>, vector<64x256xf32> -> vector<64x256xf32>
    %cst_46 = arith.constant 0.000000e+00 : f32
    %79 = vector.shape_cast %18 : vector<1x256xi1> to vector<1x256xi1>
    %80 = vector.broadcast %79 : vector<1x256xi1> to vector<64x256xi1>
    %81 = vector.broadcast %cst_46 : f32 to vector<64x256xf32>
    %82 = arith.select %80, %78, %81 : vector<64x256xi1>, vector<64x256xf32>
    %83 = arith.addf %73, %82 : vector<64x256xf32>
    %c0_47 = arith.constant 0 : index
    %c0_48 = arith.constant 0 : index
    %c33 = arith.constant 33 : index
    %84 = vector.load %arg1[%c0_47, %c0_48, %c33] : memref<1x64x290xf32, #tpu.memory_space<vmem>>, vector<1x64x256xf32>
    %85 = vector.shape_cast %84 : vector<1x64x256xf32> to vector<64x256xf32>
    %c7 = arith.constant 7 : index
    %c0_49 = arith.constant 0 : index
    %c0_50 = arith.constant 0 : index
    %86 = vector.load %arg2[%c7, %c0_49, %c0_50] : memref<9x64x64xf32, #tpu.memory_space<vmem>>, vector<1x64x64xf32>
    %87 = vector.shape_cast %86 : vector<1x64x64xf32> to vector<64x64xf32>
    %cst_51 = arith.constant dense<0.000000e+00> : vector<64x256xf32>
    %88 = tpu.matmul %87, %85, %cst_51 {dimension_numbers = #tpu.dot_dimension_numbers<[1], [0], [0], [1], [0, 0, 1, 1], [], []>} : vector<64x64xf32>, vector<64x256xf32>, vector<64x256xf32> -> vector<64x256xf32>
    %89 = arith.addf %83, %88 : vector<64x256xf32>
    %c0_52 = arith.constant 0 : index
    %c0_53 = arith.constant 0 : index
    %c34 = arith.constant 34 : index
    %90 = vector.load %arg1[%c0_52, %c0_53, %c34] : memref<1x64x290xf32, #tpu.memory_space<vmem>>, vector<1x64x256xf32>
    %91 = vector.shape_cast %90 : vector<1x64x256xf32> to vector<64x256xf32>
    %c8 = arith.constant 8 : index
    %c0_54 = arith.constant 0 : index
    %c0_55 = arith.constant 0 : index
    %92 = vector.load %arg2[%c8, %c0_54, %c0_55] : memref<9x64x64xf32, #tpu.memory_space<vmem>>, vector<1x64x64xf32>
    %93 = vector.shape_cast %92 : vector<1x64x64xf32> to vector<64x64xf32>
    %cst_56 = arith.constant dense<0.000000e+00> : vector<64x256xf32>
    %94 = tpu.matmul %93, %91, %cst_56 {dimension_numbers = #tpu.dot_dimension_numbers<[1], [0], [0], [1], [0, 0, 1, 1], [], []>} : vector<64x64xf32>, vector<64x256xf32>, vector<64x256xf32> -> vector<64x256xf32>
    %cst_57 = arith.constant 0.000000e+00 : f32
    %95 = vector.shape_cast %20 : vector<1x256xi1> to vector<1x256xi1>
    %96 = vector.broadcast %95 : vector<1x256xi1> to vector<64x256xi1>
    %97 = vector.broadcast %cst_57 : f32 to vector<64x256xf32>
    %98 = arith.select %96, %94, %97 : vector<64x256xi1>, vector<64x256xf32>
    %99 = arith.addf %89, %98 : vector<64x256xf32>
    %c0_58 = arith.constant 0 : index
    %c0_59 = arith.constant 0 : index
    %100 = vector.load %arg3[%c0_58, %c0_59] : memref<64x1xf32, #tpu.memory_space<vmem>>, vector<64x1xf32>
    %101 = vector.broadcast %100 : vector<64x1xf32> to vector<64x256xf32>
    %102 = arith.addf %99, %101 : vector<64x256xf32>
    %c0_60 = arith.constant 0 : index
    %c0_61 = arith.constant 0 : index
    %c0_62 = arith.constant 0 : index
    %103 = vector.load %arg4[%c0_60, %c0_61, %c0_62] : memref<1x64x256xf32, #tpu.memory_space<vmem>>, vector<1x64x256xf32>
    %104 = vector.shape_cast %103 : vector<1x64x256xf32> to vector<64x256xf32>
    %105 = vector.shape_cast %102 : vector<64x256xf32> to vector<1x64x256xf32>
    tpu.vector_store %arg4[%c0_60, %c0_61, %c0_62], %105 {strides = array<i32>} : memref<1x64x256xf32, #tpu.memory_space<vmem>>, vector<1x64x256xf32>,
    return
  }
  func.func @transform_0(%arg0: i32) -> (i32, i32, i32) {
    %c0_i32 = arith.constant 0 : i32
    %c0_i32_0 = arith.constant 0 : i32
    %c0_i32_1 = arith.constant 0 : i32
    return %arg0, %c0_i32, %c0_i32_0 : i32, i32, i32
  }
  func.func @transform_1(%arg0: i32) -> (i32, i32, i32) {
    %c0_i32 = arith.constant 0 : i32
    %c0_i32_0 = arith.constant 0 : i32
    %c0_i32_1 = arith.constant 0 : i32
    %c0_i32_2 = arith.constant 0 : i32
    return %c0_i32, %c0_i32_0, %c0_i32_1 : i32, i32, i32
  }
  func.func @transform_2(%arg0: i32) -> (i32, i32) {
    %c0_i32 = arith.constant 0 : i32
    %c0_i32_0 = arith.constant 0 : i32
    %c0_i32_1 = arith.constant 0 : i32
    return %c0_i32, %c0_i32_0 : i32, i32
  }
  func.func @transform_3(%arg0: i32) -> (i32, i32, i32) {
    %c0_i32 = arith.constant 0 : i32
    %c0_i32_0 = arith.constant 0 : i32
    %c0_i32_1 = arith.constant 0 : i32
    return %arg0, %c0_i32, %c0_i32_0 : i32, i32, i32
  }
}

</mosaic_0001>

<bundles_post_ra>
// kernel: tpu_custom_call.1
= control target key start
LH: loop header
LB: loop body
LE: loop exit
PB: predicated region body
PF: predicated region fallthrough
CT: control target
= control target key end

     0   :  { %8 = vsyncpa [#allocation3], 0  ;;  %s4561_s0 = inlined_call_operand.hbm [shape: f32[2,64,290], index: 0, kind: input, shape index: {}]   ;;  %s4562_s1 = inlined_call_operand.hbm [shape: f32[9,64,64], index: 1, kind: input, shape index: {}]   ;;  %s4563_s2 = inlined_call_operand.vmem [shape: f32[64,1], index: 2, kind: input, shape index: {}]   ;;  %s4564_s3 = inlined_call_operand.hbm [shape: f32[2,64,256], index: 3, kind: output, shape index: {}]  }
   0x1   :  { %10 = vsyncpa [#allocation3 + $0x1], 0 }
   0x2   :  { %11 = vsyncpa [#allocation6], 0 }
   0x3   :  { %12 = vsyncpa [#allocation4], 0 }
   0x4   :  { %14 = vsyncpa [#allocation4 + $0x1], 0  ;;  %s3047_s12 = smov 0   ;;  %s3049_s13 = smov 0  }
   0x5   :  { %s3051_s14 = smov 0   ;;  %s3053_s15 = smov 0  }
   0x6 LB: > { %s3068_s16 = sadd.s32 4294967295, %s3006_s15   ;;  %s2686_s17 = sadd.s32 4294967294, %s3006_s15   ;;  %s3006_s15 = sphi %s3053_s15, %s4638_s15   ;;  %s3002_s14 = sphi %s3051_s14, %s4637_s14   ;;  %s2998_s13 = sphi %s3049_s13, %s4636_s13   ;;  %s2994_s12 = sphi %s3047_s12, %s4635_s12  }
   0x7   : > { %p40_p0 = scmp.ne.s32.totalorder %s2998_s13, %s2994_s12  ;;  %p4565_p1 = scmp.eq.s32.totalorder %s3068_s16, 0 }
   0x8   : > { %p112_p3 = scmp.eq.s32.totalorder %s2686_s17, 1  ;;  %p2687_p5 = scmp.ge.s32.totalorder %s3006_s15, 1 }
   0x9   : > { %p3077_p4 = por %p4565_p1, %p40_p0  ;;  %p119_p7 = scmp.lt.s32.totalorder %s3006_s15, 3 }
   0xa   : > { %p3082_p6 = por %p112_p3, %p40_p0  ;;  %s3008_s21 = smov [#allocation5]  }
   0xb   : > { %s4569_s18 = scalar_select %p3077_p4, 1, 0 }
   0xc   : > { %s4570_s19 = scalar_select %p3082_p6, 1, 0 }
   0xd   : > { %p3087_p8 = pnand %p2687_p5, %p119_p7  ;;  %s131_s22 = sshll.u32 %s3008_s21, 4  ;;  %s132_s22 = int_to_ptr.vmem [resolvable:$true] %s131_s22 }
   0xe   : > { %s3101_s24 = sadd.s32 1, %s3006_s15   ;;  %s27_s25 = sadd.s32 1, %s3002_s14 }
   0xf   : > { %s4571_s20 = scalar_select %p3087_p8, 1, 0 }
  0x10   : > { %p2799_p9 = pneg %p3087_p8  ;;  %s24_s26 = ssub.s32 %s3006_s15, %s3101_s24 }
  0x11   : > { %s2895_s27 = scalar_lea.vmem %s132_s22, 9216  ;;  %p2903_p5 = scmp.lt.s32.totalorder %s132_s22, %s132_s22 }
  0x12   : > { %p3096_p11 = pnand %p2799_p9, %p4565_p1  ;;  %p2896_p13 = scmp.ne.s32.totalorder %s132_s22, %s2895_s27 }
  0x13   : > { %p2904_p7 = scmp.lt.s32.totalorder %s2895_s27, %s2895_s27 }
  0x14   : > { %p2886_p12 = pneg %p3096_p11 }
  0x15   : > { %p2905_p10 = por %p2904_p7, %p2903_p5 }
  0x16   : > { %p2898_p0 = pnand %p2896_p13, %p2886_p12 }
  0x18   : > { %p2899_p3 = pneg %p2898_p0 }
  0x1a   : > { %p2906_p2 = pnand %p2905_p10, %p2899_p3 }
  0x1c   : > { %2909 = shalt.err (!%p2906_p2)
}
  0x1d   : > { %s3009_s28 = smov 128   ;;  %s3010_s29 = smov 8  }
  0x1e   : > { %2802 = dma.hbm_to_vmem [thread:$0]  (!%p3096_p11), %s4562_s1, 9216, %s132_s22, [#allocation6], %s3009_s28, %s3009_s28, %s3010_s29  }
  0x1f   : > { %p25_p9 = scmp.eq.s32.totalorder %s24_s26, 0  ;;  %p34_p12 = scmp.ne.s32.totalorder %s3002_s14, %s2998_s13 }
  0x20   : > { %p35_p10 = scmp.eq.s32.totalorder %s3006_s15, 0  ;;  %p2812_p2 = scmp.lt.s32.totalorder %s3006_s15, 2 }
  0x21   : > { %s3118_s5 = scalar_select %p25_p9, %s3002_s14, %s27_s25  }
  0x22   : > { %p36_p13 = por %p35_p10, %p34_p12  ;;  %p4573_p0 = scmp.eq.s32.totalorder %s3068_s16, 1 }
  0x23   : > { %s148_s7 = sand.u32 1, %s3002_s14   ;;  %s2789_s8 = smul.u32 3072, %s3006_s15 }
  0x24   : > { %p3122_p3 = por %p4573_p0, %p34_p12  ;;  %s2788_s9 = smul.u32 192, %s148_s7 }
  0x25   : > { %s3131_s17 = scalar_lea.hbm %s4561_s0, %s2789_s8  ;;  %p3133_p11 = pnand %p2812_p2, %p36_p13 }
  0x26   : > { %s4574_s6 = scalar_select %p3122_p3, 1, 0 }
  0x27   : > { %s152_s22 = scalar_lea.vmem [#allocation2], %s2788_s9  ;;  %s3139_s25 = scalar_lea.sflag [#allocation3], %s148_s7 }
  0x28   : > { %s159_s23 = sshll.u32 %s152_s22, 4  ;;  %s2910_s26 = scalar_lea.hbm %s3131_s17, 3072  ;;  %s3137_s23 = int_to_ptr.vmem [resolvable:$true] %s159_s23 }
  0x29   : > { %p2911_p5 = scmp.ne.s32.totalorder %s3131_s17, %s2910_s26  ;;  %p2912_p7 = pneg %p3133_p11 }
  0x2a   : > { %s2915_s29 = scalar_lea.hbm %s4561_s0, 6144  ;;  %p2916_p10 = scmp.lt.s32.totalorder %s3131_s17, %s4561_s0 }
  0x2b   : > { %p2913_p9 = pnand %p2912_p7, %p2911_p5  ;;  %p2917_p2 = scmp.lt.s32.totalorder %s2915_s29, %s2910_s26 }
  0x2d   : > { %p2914_p12 = pneg %p2913_p9  ;;  %p2918_p13 = por %p2917_p2, %p2916_p10 }
  0x2f   : > { %p2919_p0 = pnand %p2918_p13, %p2914_p12 }
  0x31   : > { %2922 = shalt.err (!%p2919_p0)
}
  0x32   : > { %s2923_s7 = scalar_lea.vmem %s3137_s23, 3072  ;;  %s3011_s8 = smov [#allocation2]  }
  0x33   : > { %p2924_p1 = scmp.ne.s32.totalorder %s3137_s23, %s2923_s7  ;;  %s2928_s9 = sshll.u32 %s3011_s8, 4  ;;  %s2929_s9 = int_to_ptr.vmem [resolvable:$false] %s2928_s9 }
  0x34   : > { %s2930_s10 = scalar_lea.vmem %s2929_s9, 6144  ;;  %p2931_p9 = scmp.lt.s32.totalorder %s3137_s23, %s2929_s9 }
  0x35   : > { %p2926_p6 = pnand %p2924_p1, %p2912_p7  ;;  %p2932_p3 = scmp.lt.s32.totalorder %s2930_s10, %s2923_s7 }
  0x37   : > { %p2927_p5 = pneg %p2926_p6  ;;  %p2933_p4 = por %p2932_p3, %p2931_p9 }
  0x39   : > { %p2934_p8 = pnand %p2933_p4, %p2927_p5 }
  0x3b   : > { %2937 = shalt.err (!%p2934_p8)
}
  0x3c   : > { %s3012_s11 = smov 384   ;;  %s3013_s22 = smov 24  }
  0x3d   : > { %2806 = dma.hbm_to_vmem [thread:$0]  (!%p3133_p11), %s3131_s17, 3072, %s3137_s23, %s3139_s25, %s3012_s11, %s3012_s11, %s3013_s22  }
  0x3e   : > { %p4576_p1 = scmp.ne.s32.totalorder %s4571_s20, 0 }
  0x40   : > { %171 = sbr.rel (%p4576_p1) target bundleno = 819 (0x333), region = 32 }
  0x45   : > { %s3163_s26 = sand.u32 1, %s2998_s13   ;;  %p4577_p4 = scmp.ne.s32.totalorder %s4569_s18, 0 }
  0x46   : > { %s2790_s27 = smul.u32 192, %s3163_s26  ;;  %s174_s28 = scalar_lea.sflag [#allocation3], %s3163_s26 }
  0x48   : > { %s3167_s29 = scalar_lea.vmem [#allocation2], %s2790_s27 }
  0x49   : > { %2981 = dma.done.wait (%p4577_p4), %s174_s28, 3072  }
  0x4a   : > { %2983 = vsyncadd (%p4577_p4), %s174_s28, 4294964224  ;;  %p4578_p6 = scmp.eq.s32.totalorder %s3068_s16, 0 }
  0x4c   : > { %2985 = dma.done.wait (%p4578_p6), [#allocation6], 9216   ;;  %p4579_p8 = pmov %p4578_p6 }
  0x4d   : > { %v3178_v0 = vld [vmem:[%s3167_s29 + $0x10] sm:$0xff]  ;;  %v3181_v1 = vld [vmem:[%s3167_s29] sm:$0xff]  ;;  %s3014_s18 = smov 127   ;;  %v3188_v2 = vld [vmem:[%s3167_s29 + $0x18] sm:$0xff]  ;;  %v3015_v19 = vmov 0.0   ;;  %s3016_s20 = smov 126  }
  0x4e   : > { %2987 = vsyncadd (%p4579_p8), [#allocation6], 4294958080  ;;  %494 = vrot.lane.b32.xlu1 %v3178_v0, %s3014_s18  ;;  %490 = vrot.lane.b32.xlu0 %v3181_v1, %s3014_s18  ;;  %v3191_v3 = vld [vmem:[%s3167_s29 + $0x8] sm:$0xff]  ;;  %v3194_v4 = vld [vmem:[%s3167_s29 + $0xb0] sm:$0xff]  ;;  %vm259_vm0 = vcmask 523264   ;;  %s3017_s17 = smov 112  }
  0x4f   : > { %2772 = vmatprep.subr.mxu1 %v3194_v4  ;;  %300 = vmatprep.subr.mxu0 %v3194_v4  ;;  %v3203_v5 = vld [vmem:[%s3167_s29 + $0xa8] sm:$0xff]  ;;  %v3209_v7 = vld [vmem:[%s3167_s29 + $0x20] sm:$0xff]  ;;  %v3212_v8 = vld [vmem:[%s3167_s29 + $0x98] sm:$0xff]  ;;  %s3018_s21 = smov 111   ;;  %vm538_vm1 = vcmask 1039360   ;;  %vm781_vm2 = vcmask 1031168  }
  0x50   : > { %v3206_v6 = vld [vmem:[%s3167_s29 + $0x28] sm:$0xff]  ;;  %2780 = vmatpush1.msra.mxu1 %v3203_v5  ;;  %301 = vmatpush1.msra.mxu0 %v3203_v5  ;;  %v3217_v9 = vld [vmem:[%s3167_s29 + $0x90] sm:$0xff]  ;;  %v3228_v10 = vld [vmem:[%s3167_s29 + $0x80] sm:$0xff]  ;;  %s3019_s23 = smov 110   ;;  %s3020_s25 = smov 96   ;;  %vm1044_vm3 = vcmask 916480  }
  0x51   : > { %2773 = vmatprep.subr.mxu1 %v3212_v8  ;;  %302 = vmatprep.subr.mxu0 %v3212_v8  ;;  %v3231_v11 = vld [vmem:[%s3167_s29 + $0x38] sm:$0xff]  ;;  %v3234_v12 = vld [vmem:[%s3167_s29 + $0x30] sm:$0xff]  ;;  %v3242_v14 = vld [vmem:[%s3167_s29 + $0x68] sm:$0xff]  ;;  %vm1303_vm4 = vcmask 908288   ;;  %s3021_s30 = smov 95   ;;  %s3022_s4 = smov 94  }
  0x52   : > { %496 = vrot.lane.b32.xlu1 %v3188_v2, %s3014_s18  ;;  %492 = vrot.lane.b32.xlu0 %v3191_v3, %s3014_s18  ;;  %v3237_v13 = vld [vmem:[%s3167_s29 + $0x78] sm:$0xff]  ;;  %v3253_v15 = vld [vmem:[%s3167_s29 + $0x60] sm:$0xff]  ;;  %v256_v27 = vld [vmem:[#allocation5 + $0x28] sm:$0xff]  ;;  %vm1546_vm5 = vcmask 900096   ;;  %vm1805_vm6 = vcmask 785408   ;;  %vm2064_vm10 = vcmask 777216  }
  0x53   : > { %2781 = vmatpush1.msra.mxu1 %v3217_v9  ;;  %303 = vmatpush1.msra.mxu0 %v3217_v9  ;;  %v3256_v16 = vld [vmem:[%s3167_s29 + $0xb8] sm:$0xff]  ;;  %v3259_v17 = vld [vmem:[%s3167_s29 + $0x50] sm:$0xff]  ;;  %v3264_v18 = vld [vmem:[%s3167_s29 + $0x48] sm:$0xff]  ;;  %vm2307_vm12 = vcmask 769024   ;;  %s2771_s8 = sshll.u32 %s3068_s16, 11  ;;  %s2590_s16 = scalar_lea.sflag [#allocation4], %s3163_s26 }
  0x54   : > { %2774 = vmatprep.subr.mxu1 %v3228_v10  ;;  %304 = vmatprep.subr.mxu0 %v3228_v10  ;;  %v255_v20 = vld [vmem:[#allocation5 + $0x20] sm:$0xff]  ;;  %v3316_v23 = vld [vmem:[%s3167_s29 + $0x88] sm:$0xff]  ;;  %v3331_v24 = vld [vmem:[%s3167_s29 + $0x70] sm:$0xff]  ;;  %s4514_s22 = scalar_lea.hbm %s4564_s3, %s2771_s8  ;;  %p4632_p11 = scmp.ne.s32.totalorder %s4574_s6, 0 }
  0x55   : > { %2782 = vmatpush1.msra.mxu1 %v3237_v13  ;;  %305 = vmatpush1.msra.mxu0 %v3237_v13  ;;  %v251_v21 = vld [vmem:[#allocation5] sm:$0xff]  ;;  %v3346_v25 = vld [vmem:[%s3167_s29 + $0x58] sm:$0xff]  ;;  %v257_v28 = vld [vmem:[#allocation5 + $0x30] sm:$0xff]  ;;  %s3024_s28 = smov [#allocation7]  }
  0x56   : > { %500 = vrot.lane.b32.xlu1 %v3206_v6, %s3014_s18  ;;  %498 = vrot.lane.b32.xlu0 %v3209_v7, %s3014_s18  ;;  %v3295_v22 = vld [vmem:[%s3167_s29 + $0xa0] sm:$0xff]  ;;  %v252_v29 = vld [vmem:[#allocation5 + $0x8] sm:$0xff]  ;;  %v258_v30 = vld [vmem:[#allocation5 + $0x38] sm:$0xff] }
  0x57   : > { %2775 = vmatprep.subr.mxu1 %v3242_v14  ;;  %306 = vmatprep.subr.mxu0 %v3242_v14  ;;  %v3357_v26 = vld [vmem:[%s3167_s29 + $0x40] sm:$0xff]  ;;  %v253_v31 = vld [vmem:[#allocation5 + $0x10] sm:$0xff]  ;;  %v254_v32 = vld [vmem:[#allocation5 + $0x18] sm:$0xff] }
  0x58   : > { %2783 = vmatpush1.msra.mxu1 %v3253_v15  ;;  %307 = vmatpush1.msra.mxu0 %v3253_v15 }
  0x59   : > { %2776 = vmatprep.subr.mxu1 %v3259_v17  ;;  %308 = vmatprep.subr.mxu0 %v3259_v17 }
  0x5a   : > { %504 = vrot.lane.b32.xlu1 %v3231_v11, %s3014_s18  ;;  %502 = vrot.lane.b32.xlu0 %v3234_v12, %s3014_s18 }
  0x5b   : > { %2784 = vmatpush1.msra.mxu1 %v3264_v18  ;;  %309 = vmatpush1.msra.mxu0 %v3264_v18 }
  0x5c   : > { %2777 = vmatprep.subr.mxu1 %v3231_v11  ;;  %310 = vmatprep.subr.mxu0 %v3231_v11 }
  0x5d   : > { %2785 = vmatpush1.msra.mxu1 %v3234_v12  ;;  %311 = vmatpush1.msra.mxu0 %v3234_v12 }
  0x5e   : > { %536 = vrot.lane.b32.xlu1 %v3256_v16, %s3014_s18  ;;  %534 = vrot.lane.b32.xlu0 %v3194_v4, %s3014_s18 }
  0x5f   : > { %2778 = vmatprep.subr.mxu1 %v3209_v7  ;;  %372 = vmatprep.mubr.f32.mxu1 %v3015_v19 }
  0x60   : > { %2786 = vmatpush1.msra.mxu1 %v3188_v2  ;;  %312 = vmatprep.subr.mxu0 %v3209_v7 }
  0x61   : > { %2779 = vmatprep.subr.mxu1 %v3191_v3  ;;  %313 = vmatpush1.msra.mxu0 %v3188_v2 }
  0x62   : > { %777 = vrot.lane.b32.xlu1 %v3194_v4, %s3016_s20  ;;  %532 = vrot.lane.b32.xlu0 %v3203_v5, %s3014_s18 }
  0x63   : > { %2787 = vmatpush1.msra.mxu1 %v3181_v1  ;;  %314 = vmatprep.subr.mxu0 %v3191_v3 }
  0x64   : > { %2698 = vmatmul.mubr.msk.f32.vlgmr.msra.gmra.mxu1 %vm259_vm0, %v255_v20  ;;  %315 = vmatpush1.msra.mxu0 %v3181_v1 }
  0x65   : > { %348 = vmatprep.mubr.f32.mxu0 %v3015_v19  ;;  %378 = vmatprep.mubr.f32.mxu1 %v3015_v19 }
  0x66   : > { %528 = vrot.lane.b32.xlu1 %v3212_v8, %s3014_s18  ;;  %779 = vrot.lane.b32.xlu0 %v3256_v16, %s3016_s20 }
  0x67   : > { %2694 = vmatmul.mubr.msk.f32.vlgmr.msra.gmra.mxu0 %vm259_vm0, %v251_v21 }
  0x68   : > { %354 = vmatprep.mubr.f32.mxu0 %v3015_v19  ;;  %2699 = vmatmul.mubr.msk.f32.gmra.mxu1 %vm259_vm0, %v256_v27 }
  0x69   : > { %384 = vmatprep.mubr.f32.mxu1 %v3015_v19 }
  0x6a   : > { %775 = vrot.lane.b32.xlu1 %v3203_v5, %s3016_s20  ;;  %530 = vrot.lane.b32.xlu0 %v3295_v22, %s3014_s18 }
  0x6b   : > { %2695 = vmatmul.mubr.msk.f32.gmra.mxu0 %vm259_vm0, %v252_v29 }
  0x6c   : > { %2700 = vmatmul.mubr.msk.f32.gmra.mxu1 %vm259_vm0, %v257_v28  ;;  %360 = vmatprep.mubr.f32.mxu0 %v3015_v19 }
  0x6d   : > { %390 = vmatprep.mubr.f32.mxu1 %v3015_v19 }
  0x6e   : > { %771 = vrot.lane.b32.xlu1 %v3212_v8, %s3016_s20  ;;  %526 = vrot.lane.b32.xlu0 %v3217_v9, %s3014_s18 }
  0x6f   : > { %2696 = vmatmul.mubr.msk.f32.gmra.mxu0 %vm259_vm0, %v253_v31 }
  0x70   : > { %2701 = vmatmul.mubr.msk.f32.gmra.mxu1 %vm259_vm0, %v258_v30  ;;  %366 = vmatprep.mubr.f32.mxu0 %v3015_v19 }
  0x71   : > { %659 = vmatprep.mubr.f32.mxu1 %v3015_v19 }
  0x72   : > { %522 = vrot.lane.b32.xlu1 %v3228_v10, %s3014_s18  ;;  %773 = vrot.lane.b32.xlu0 %v3295_v22, %s3016_s20 }
  0x73   : > { %2697 = vmatmul.mubr.msk.f32.gmra.mxu0 %vm259_vm0, %v254_v32 }
  0x74   : > { %902 = vmatprep.mubr.f32.mxu0 %v3015_v19 }
  0x76   : > { %769 = vrot.lane.b32.xlu1 %v3217_v9, %s3016_s20  ;;  %524 = vrot.lane.b32.xlu0 %v3316_v23, %s3014_s18 }
  0x7a   : > { %765 = vrot.lane.b32.xlu1 %v3228_v10, %s3016_s20  ;;  %520 = vrot.lane.b32.xlu0 %v3237_v13, %s3014_s18 }
  0x7e   : > { %516 = vrot.lane.b32.xlu1 %v3242_v14, %s3014_s18  ;;  %767 = vrot.lane.b32.xlu0 %v3316_v23, %s3016_s20 }
  0x82   : > { %763 = vrot.lane.b32.xlu1 %v3237_v13, %s3016_s20  ;;  %518 = vrot.lane.b32.xlu0 %v3331_v24, %s3014_s18 }
  0x86   : > { %759 = vrot.lane.b32.xlu1 %v3242_v14, %s3016_s20  ;;  %514 = vrot.lane.b32.xlu0 %v3253_v15, %s3014_s18 }
  0x8a   : > { %510 = vrot.lane.b32.xlu1 %v3259_v17, %s3014_s18  ;;  %761 = vrot.lane.b32.xlu0 %v3331_v24, %s3016_s20 }
  0x8e   : > { %757 = vrot.lane.b32.xlu1 %v3253_v15, %s3016_s20  ;;  %512 = vrot.lane.b32.xlu0 %v3346_v25, %s3014_s18 }
  0x92   : > { %753 = vrot.lane.b32.xlu1 %v3259_v17, %s3016_s20  ;;  %508 = vrot.lane.b32.xlu0 %v3264_v18, %s3014_s18 }
  0x96   : > { %506 = vrot.lane.b32.xlu1 %v3357_v26, %s3014_s18  ;;  %755 = vrot.lane.b32.xlu0 %v3346_v25, %s3016_s20 }
  0x9a   : > { %747 = vrot.lane.b32.xlu1 %v3231_v11, %s3016_s20  ;;  %751 = vrot.lane.b32.xlu0 %v3264_v18, %s3016_s20 }
  0x9e   : > { %745 = vrot.lane.b32.xlu1 %v3234_v12, %s3016_s20  ;;  %749 = vrot.lane.b32.xlu0 %v3357_v26, %s3016_s20 }
  0xa2   : > { %743 = vrot.lane.b32.xlu1 %v3206_v6, %s3016_s20  ;;  %741 = vrot.lane.b32.xlu0 %v3209_v7, %s3016_s20 }
  0xa6   : > { %735 = vrot.lane.b32.xlu1 %v3191_v3, %s3016_s20  ;;  %739 = vrot.lane.b32.xlu0 %v3188_v2, %s3016_s20 }
  0xaa   : > { %733 = vrot.lane.b32.xlu1 %v3181_v1, %s3016_s20  ;;  %737 = vrot.lane.b32.xlu0 %v3178_v0, %s3016_s20 }
  0xae   : > { %1042 = vrot.lane.b32.xlu1 %v3256_v16, %s3017_s17  ;;  %1040 = vrot.lane.b32.xlu0 %v3194_v4, %s3017_s17 }
  0xb2   : > { %1299 = vrot.lane.b32.xlu1 %v3194_v4, %s3018_s21  ;;  %1038 = vrot.lane.b32.xlu0 %v3203_v5, %s3017_s17 }
  0xb6   : > { %1034 = vrot.lane.b32.xlu1 %v3212_v8, %s3017_s17  ;;  %1301 = vrot.lane.b32.xlu0 %v3256_v16, %s3018_s21 }
  0xba   : > { %1297 = vrot.lane.b32.xlu1 %v3203_v5, %s3018_s21  ;;  %1036 = vrot.lane.b32.xlu0 %v3295_v22, %s3017_s17 }
  0xbe   : > { %1293 = vrot.lane.b32.xlu1 %v3212_v8, %s3018_s21  ;;  %1032 = vrot.lane.b32.xlu0 %v3217_v9, %s3017_s17 }
  0xc0   : > { %v3415_v33 = vpop.permute.xlu1 %494  ;;  %v3417_v34 = vpop.permute.xlu0 %490 }
  0xc2   : > { %1028 = vrot.lane.b32.xlu1 %v3228_v10, %s3017_s17  ;;  %1295 = vrot.lane.b32.xlu0 %v3295_v22, %s3018_s21 }
  0xc4   : > { %v3423_v35 = vpop.permute.xlu1 %496  ;;  %v3425_v36 = vpop.permute.xlu0 %492 }
  0xc6   : > { %1291 = vrot.lane.b32.xlu1 %v3217_v9, %s3018_s21  ;;  %1030 = vrot.lane.b32.xlu0 %v3316_v23, %s3017_s17 }
  0xc8   : > { %v3431_v37 = vpop.permute.xlu1 %500  ;;  %v3433_v38 = vpop.permute.xlu0 %498 }
  0xca   : > { %1287 = vrot.lane.b32.xlu1 %v3228_v10, %s3018_s21  ;;  %1026 = vrot.lane.b32.xlu0 %v3237_v13, %s3017_s17 }
  0xcc   : > { %v3439_v39 = vpop.permute.xlu1 %504  ;;  %v3441_v40 = vpop.permute.xlu0 %502 }
  0xce   : > { %1022 = vrot.lane.b32.xlu1 %v3242_v14, %s3017_s17  ;;  %1289 = vrot.lane.b32.xlu0 %v3316_v23, %s3018_s21 }
  0xd0   : > { %v537_v41 = vpop.permute.xlu1 %536  ;;  %v535_v42 = vpop.permute.xlu0 %534 }
  0xd1   : > { %v554_v43 = vsel %vm538_vm1, %v535_v42, %v537_v41 }
  0xd2   : > { %1285 = vrot.lane.b32.xlu1 %v3237_v13, %s3018_s21  ;;  %1024 = vrot.lane.b32.xlu0 %v3331_v24, %s3017_s17 }
  0xd3   : > { %611 = vmatprep.subr.mxu1 %v554_v43 }
  0xd4   : > { %v778_v44 = vpop.permute.xlu1 %777  ;;  %v533_v45 = vpop.permute.xlu0 %532 }
  0xd5   : > { %v553_v46 = vsel %vm538_vm1, %v533_v45, %v535_v42 }
  0xd6   : > { %1281 = vrot.lane.b32.xlu1 %v3242_v14, %s3018_s21  ;;  %1020 = vrot.lane.b32.xlu0 %v3253_v15, %s3017_s17 }
  0xd7   : > { %612 = vmatpush1.msra.mxu1 %v553_v46 }
  0xd8   : > { %v529_v47 = vpop.permute.xlu1 %528  ;;  %v780_v48 = vpop.permute.xlu0 %779 }
  0xd9   : > { %v797_v49 = vsel %vm781_vm2, %v778_v44, %v780_v48 }
  0xda   : > { %1016 = vrot.lane.b32.xlu1 %v3259_v17, %s3017_s17  ;;  %1283 = vrot.lane.b32.xlu0 %v3331_v24, %s3018_s21 }
  0xdb   : > { %854 = vmatprep.subr.mxu0 %v797_v49 }
  0xdc   : > { %v776_v50 = vpop.permute.xlu1 %775  ;;  %v531_v51 = vpop.permute.xlu0 %530 }
  0xdd   : > { %v796_v52 = vsel %vm781_vm2, %v776_v50, %v778_v44  ;;  %v552_v53 = vsel %vm538_vm1, %v529_v47, %v531_v51 }
  0xde   : > { %1279 = vrot.lane.b32.xlu1 %v3253_v15, %s3018_s21  ;;  %1018 = vrot.lane.b32.xlu0 %v3346_v25, %s3017_s17 }
  0xdf   : > { %613 = vmatprep.subr.mxu1 %v552_v53  ;;  %855 = vmatpush1.msra.mxu0 %v796_v52 }
  0xe0   : > { %v772_v54 = vpop.permute.xlu1 %771  ;;  %v527_v55 = vpop.permute.xlu0 %526 }
  0xe1   : > { %v551_v56 = vsel %vm538_vm1, %v527_v55, %v529_v47 }
  0xe2   : > { %1275 = vrot.lane.b32.xlu1 %v3259_v17, %s3018_s21  ;;  %1014 = vrot.lane.b32.xlu0 %v3264_v18, %s3017_s17 }
  0xe3   : > { %614 = vmatpush1.msra.mxu1 %v551_v56 }
  0xe4   : > { %v523_v57 = vpop.permute.xlu1 %522  ;;  %v774_v58 = vpop.permute.xlu0 %773 }
  0xe5   : > { %v795_v59 = vsel %vm781_vm2, %v772_v54, %v774_v58 }
  0xe6   : > { %1010 = vrot.lane.b32.xlu1 %v3231_v11, %s3017_s17  ;;  %1277 = vrot.lane.b32.xlu0 %v3346_v25, %s3018_s21 }
  0xe7   : > { %856 = vmatprep.subr.mxu0 %v795_v59 }
  0xe8   : > { %v770_v60 = vpop.permute.xlu1 %769  ;;  %v525_v61 = vpop.permute.xlu0 %524 }
  0xe9   : > { %v794_v62 = vsel %vm781_vm2, %v770_v60, %v772_v54  ;;  %v550_v63 = vsel %vm538_vm1, %v523_v57, %v525_v61  ;;  %v543_v60 = vsel %vm538_vm1, %v3441_v40, %v3439_v39  ;;  %v458_v40 = vld [vmem:[#allocation5 + $0x40] sm:$0xff] }
  0xea   : > { %1273 = vrot.lane.b32.xlu1 %v3264_v18, %s3018_s21  ;;  %1012 = vrot.lane.b32.xlu0 %v3357_v26, %s3017_s17 }
  0xeb   : > { %615 = vmatprep.subr.mxu1 %v550_v63  ;;  %857 = vmatpush1.msra.mxu0 %v794_v62  ;;  %v542_v63 = vsel %vm538_vm1, %v3433_v38, %v3431_v37  ;;  %v539_v37 = vsel %vm538_vm1, %v3417_v34, %v3425_v36 }
  0xec   : > { %v766_v20 = vpop.permute.xlu1 %765  ;;  %v521_v21 = vpop.permute.xlu0 %520 }
  0xed   : > { %v549_v27 = vsel %vm538_vm1, %v521_v21, %v523_v57  ;;  %v541_v21 = vsel %vm538_vm1, %v3423_v35, %v3433_v38 }
  0xee   : > { %1269 = vrot.lane.b32.xlu1 %v3231_v11, %s3018_s21  ;;  %1008 = vrot.lane.b32.xlu0 %v3234_v12, %s3017_s17 }
  0xef   : > { %616 = vmatpush1.msra.mxu1 %v549_v27 }
  0xf0   : > { %v517_v28 = vpop.permute.xlu1 %516  ;;  %v768_v29 = vpop.permute.xlu0 %767 }
  0xf1   : > { %v793_v30 = vsel %vm781_vm2, %v766_v20, %v768_v29 }
  0xf2   : > { %1004 = vrot.lane.b32.xlu1 %v3209_v7, %s3017_s17  ;;  %1271 = vrot.lane.b32.xlu0 %v3357_v26, %s3018_s21 }
  0xf3   : > { %858 = vmatprep.subr.mxu0 %v793_v30  ;;  %v460_v30 = vld [vmem:[#allocation5 + $0x50] sm:$0xff] }
  0xf4   : > { %v764_v31 = vpop.permute.xlu1 %763  ;;  %v519_v32 = vpop.permute.xlu0 %518 }
  0xf5   : > { %v792_v41 = vsel %vm781_vm2, %v764_v31, %v766_v20  ;;  %v548_v42 = vsel %vm538_vm1, %v517_v28, %v519_v32 }
  0xf6   : > { %1267 = vrot.lane.b32.xlu1 %v3234_v12, %s3018_s21  ;;  %1006 = vrot.lane.b32.xlu0 %v3206_v6, %s3017_s17 }
  0xf7   : > { %617 = vmatprep.subr.mxu1 %v548_v42  ;;  %859 = vmatpush1.msra.mxu0 %v792_v41  ;;  %v461_v42 = vld [vmem:[#allocation5 + $0x58] sm:$0xff] }
  0xf8   : > { %v760_v43 = vpop.permute.xlu1 %759  ;;  %v515_v44 = vpop.permute.xlu0 %514 }
  0xf9   : > { %v547_v45 = vsel %vm538_vm1, %v515_v44, %v517_v28 }
  0xfa   : > { %1263 = vrot.lane.b32.xlu1 %v3209_v7, %s3018_s21  ;;  %1002 = vrot.lane.b32.xlu0 %v3188_v2, %s3017_s17 }
  0xfb   : > { %618 = vmatpush1.msra.mxu1 %v547_v45 }
  0xfc   : > { %v511_v46 = vpop.permute.xlu1 %510  ;;  %v762_v47 = vpop.permute.xlu0 %761 }
  0xfd   : > { %v791_v48 = vsel %vm781_vm2, %v760_v43, %v762_v47  ;;  %v725_v47 = vld [vmem:[#allocation5 + $0x80] sm:$0xff] }
  0xfe   : > { %998 = vrot.lane.b32.xlu1 %v3191_v3, %s3017_s17  ;;  %1265 = vrot.lane.b32.xlu0 %v3206_v6, %s3018_s21 }
  0xff   : > { %860 = vmatprep.subr.mxu0 %v791_v48  ;;  %v462_v48 = vld [vmem:[#allocation5 + $0x60] sm:$0xff] }
 0x100   : > { %v758_v49 = vpop.permute.xlu1 %757  ;;  %v513_v50 = vpop.permute.xlu0 %512 }
 0x101   : > { %v790_v51 = vsel %vm781_vm2, %v758_v49, %v760_v43  ;;  %v546_v52 = vsel %vm538_vm1, %v511_v46, %v513_v50 }
 0x102   : > { %1261 = vrot.lane.b32.xlu1 %v3188_v2, %s3018_s21  ;;  %1000 = vrot.lane.b32.xlu0 %v3178_v0, %s3017_s17 }
 0x103   : > { %619 = vmatprep.subr.mxu1 %v546_v52  ;;  %861 = vmatpush1.msra.mxu0 %v790_v51  ;;  %v726_v52 = vld [vmem:[#allocation5 + $0x88] sm:$0xff] }
 0x104   : > { %v754_v53 = vpop.permute.xlu1 %753  ;;  %v509_v54 = vpop.permute.xlu0 %508 }
 0x105   : > { %v545_v55 = vsel %vm538_vm1, %v509_v54, %v511_v46 }
 0x106   : > { %1257 = vrot.lane.b32.xlu1 %v3191_v3, %s3018_s21  ;;  %996 = vrot.lane.b32.xlu0 %v3181_v1, %s3017_s17 }
 0x107   : > { %620 = vmatpush1.msra.mxu1 %v545_v55 }
 0x108   : > { %v507_v56 = vpop.permute.xlu1 %506  ;;  %v756_v57 = vpop.permute.xlu0 %755 }
 0x109   : > { %v544_v58 = vsel %vm538_vm1, %v3439_v39, %v507_v56  ;;  %v789_v59 = vsel %vm781_vm2, %v754_v53, %v756_v57  ;;  %v540_v39 = vsel %vm538_vm1, %v3425_v36, %v3415_v33  ;;  %v459_v33 = vld [vmem:[#allocation5 + $0x48] sm:$0xff]  ;;  %v727_v57 = vld [vmem:[#allocation5 + $0x90] sm:$0xff] }
 0x10a   : > { %1255 = vrot.lane.b32.xlu1 %v3181_v1, %s3018_s21  ;;  %1259 = vrot.lane.b32.xlu0 %v3178_v0, %s3018_s21 }
 0x10b   : > { %621 = vmatprep.subr.mxu1 %v544_v58  ;;  %862 = vmatprep.subr.mxu0 %v789_v59  ;;  %v464_v58 = vld [vmem:[#allocation5 + $0x70] sm:$0xff] }
 0x10c   : > { %622 = vmatpush1.msra.mxu1 %v543_v60  ;;  %v748_v61 = vpop.permute.xlu1 %747  ;;  %v752_v62 = vpop.permute.xlu0 %751 }
 0x10d   : > { %v788_v20 = vsel %vm781_vm2, %v752_v62, %v754_v53  ;;  %623 = vmatprep.subr.mxu1 %v542_v63  ;;  %v463_v53 = vld [vmem:[#allocation5 + $0x68] sm:$0xff]  ;;  %v728_v62 = vld [vmem:[#allocation5 + $0x98] sm:$0xff] }
 0x10e   : > { %624 = vmatpush1.msra.mxu1 %v541_v21  ;;  %1544 = vrot.lane.b32.xlu1 %v3256_v16, %s3019_s23  ;;  %v465_v63 = vld [vmem:[#allocation5 + $0x78] sm:$0xff] }
 0x10f   : > { %1542 = vrot.lane.b32.xlu0 %v3194_v4, %s3019_s23  ;;  %625 = vmatprep.subr.mxu1 %v540_v39 }
 0x110   : > { %863 = vmatpush1.msra.mxu0 %v788_v20  ;;  %626 = vmatpush1.msra.mxu1 %v539_v37  ;;  %v746_v35 = vpop.permute.xlu1 %745  ;;  %v750_v38 = vpop.permute.xlu0 %749  ;;  %v729_v37 = vld [vmem:[#allocation5 + $0xa0] sm:$0xff] }
 0x111   : > { %v786_v27 = vsel %vm781_vm2, %v746_v35, %v748_v61  ;;  %v787_v28 = vsel %vm781_vm2, %v748_v61, %v750_v38  ;;  %2702 = vmatmul.mubr.msk.f32.vlgmr.msra.gmra.mxu1 %vm259_vm0, %v458_v40 }
 0x112   : > { %1801 = vrot.lane.b32.xlu1 %v3194_v4, %s3020_s25  ;;  %864 = vmatprep.subr.mxu0 %v787_v28  ;;  %v730_v28 = vld [vmem:[#allocation5 + $0xa8] sm:$0xff] }
 0x113   : > { %1540 = vrot.lane.b32.xlu0 %v3203_v5, %s3019_s23  ;;  %865 = vmatpush1.msra.mxu0 %v786_v27 }
 0x114   : > { %v744_v34 = vpop.permute.xlu1 %743  ;;  %v742_v36 = vpop.permute.xlu0 %741  ;;  %665 = vmatprep.mubr.f32.mxu1 %v3015_v19 }
 0x115   : > { %v785_v29 = vsel %vm781_vm2, %v742_v36, %v744_v34  ;;  %2703 = vmatmul.mubr.msk.f32.gmra.mxu1 %vm259_vm0, %v459_v33 }
 0x116   : > { %1536 = vrot.lane.b32.xlu1 %v3212_v8, %s3019_s23  ;;  %866 = vmatprep.subr.mxu0 %v785_v29  ;;  %v731_v29 = vld [vmem:[#allocation5 + $0xb0] sm:$0xff] }
 0x117   : > { %1803 = vrot.lane.b32.xlu0 %v3256_v16, %s3020_s25  ;;  %671 = vmatprep.mubr.f32.mxu1 %v3015_v19 }
 0x118   : > { %v736_v31 = vpop.permute.xlu1 %735  ;;  %v740_v32 = vpop.permute.xlu0 %739 }
 0x119   : > { %v784_v41 = vsel %vm781_vm2, %v740_v32, %v742_v36  ;;  %2704 = vmatmul.mubr.msk.f32.gmra.mxu1 %vm259_vm0, %v460_v30 }
 0x11a   : > { %1799 = vrot.lane.b32.xlu1 %v3203_v5, %s3020_s25  ;;  %867 = vmatpush1.msra.mxu0 %v784_v41  ;;  %v732_v41 = vld [vmem:[#allocation5 + $0xb8] sm:$0xff] }
 0x11b   : > { %1538 = vrot.lane.b32.xlu0 %v3295_v22, %s3019_s23  ;;  %677 = vmatprep.mubr.f32.mxu1 %v3015_v19 }
 0x11c   : > { %v734_v43 = vpop.permute.xlu1 %733  ;;  %v738_v44 = vpop.permute.xlu0 %737 }
 0x11d   : > { %v782_v45 = vsel %vm781_vm2, %v734_v43, %v736_v31  ;;  %v783_v46 = vsel %vm781_vm2, %v736_v31, %v738_v44  ;;  %2705 = vmatmul.mubr.msk.f32.gmra.mxu1 %vm259_vm0, %v461_v42 }
 0x11e   : > { %1795 = vrot.lane.b32.xlu1 %v3212_v8, %s3020_s25  ;;  %868 = vmatprep.subr.mxu0 %v783_v46 }
 0x11f   : > { %1534 = vrot.lane.b32.xlu0 %v3217_v9, %s3019_s23  ;;  %869 = vmatpush1.msra.mxu0 %v782_v45 }
 0x120   : > { %v1043_v49 = vpop.permute.xlu1 %1042  ;;  %v1041_v50 = vpop.permute.xlu0 %1040  ;;  %2710 = vmatmul.mubr.msk.f32.vlgmr.msra.gmra.mxu0 %vm259_vm0, %v725_v47  ;;  %683 = vmatprep.mubr.f32.mxu1 %v3015_v19 }
 0x121   : > { %v1060_v51 = vsel %vm1044_vm3, %v1041_v50, %v1043_v49  ;;  %908 = vmatprep.mubr.f32.mxu0 %v3015_v19  ;;  %2706 = vmatmul.mubr.msk.f32.gmra.mxu1 %vm259_vm0, %v462_v48 }
 0x122   : > { %1530 = vrot.lane.b32.xlu1 %v3228_v10, %s3019_s23  ;;  %1117 = vmatprep.subr.mxu1 %v1060_v51 }
 0x123   : > { %1797 = vrot.lane.b32.xlu0 %v3295_v22, %s3020_s25  ;;  %689 = vmatprep.mubr.f32.mxu1 %v3015_v19 }
 0x124   : > { %v1300_v54 = vpop.permute.xlu1 %1299  ;;  %v1039_v55 = vpop.permute.xlu0 %1038  ;;  %2711 = vmatmul.mubr.msk.f32.gmra.mxu0 %vm259_vm0, %v726_v52 }
 0x125   : > { %v1059_v56 = vsel %vm1044_vm3, %v1039_v55, %v1041_v50  ;;  %914 = vmatprep.mubr.f32.mxu0 %v3015_v19  ;;  %2707 = vmatmul.mubr.msk.f32.gmra.mxu1 %vm259_vm0, %v463_v53 }
 0x126   : > { %1793 = vrot.lane.b32.xlu1 %v3217_v9, %s3020_s25  ;;  %1118 = vmatpush1.msra.mxu1 %v1059_v56 }
 0x127   : > { %1532 = vrot.lane.b32.xlu0 %v3316_v23, %s3019_s23  ;;  %695 = vmatprep.mubr.f32.mxu1 %v3015_v19 }
 0x128   : > { %v1035_v59 = vpop.permute.xlu1 %1034  ;;  %v1302_v60 = vpop.permute.xlu0 %1301  ;;  %2712 = vmatmul.mubr.msk.f32.gmra.mxu0 %vm259_vm0, %v727_v57 }
 0x129   : > { %v1319_v61 = vsel %vm1303_vm4, %v1300_v54, %v1302_v60  ;;  %920 = vmatprep.mubr.f32.mxu0 %v3015_v19  ;;  %2708 = vmatmul.mubr.msk.f32.gmra.mxu1 %vm259_vm0, %v464_v58 }
 0x12a   : > { %1789 = vrot.lane.b32.xlu1 %v3228_v10, %s3020_s25  ;;  %1376 = vmatprep.subr.mxu0 %v1319_v61 }
 0x12b   : > { %1528 = vrot.lane.b32.xlu0 %v3237_v13, %s3019_s23  ;;  %701 = vmatprep.mubr.f32.mxu1 %v3015_v19 }
 0x12c   : > { %v1298_v20 = vpop.permute.xlu1 %1297  ;;  %v1037_v21 = vpop.permute.xlu0 %1036  ;;  %2713 = vmatmul.mubr.msk.f32.gmra.mxu0 %vm259_vm0, %v728_v62 }
 0x12d   : > { %v1318_v39 = vsel %vm1303_vm4, %v1298_v20, %v1300_v54  ;;  %v1058_v40 = vsel %vm1044_vm3, %v1035_v59, %v1037_v21  ;;  %926 = vmatprep.mubr.f32.mxu0 %v3015_v19  ;;  %2709 = vmatmul.mubr.msk.f32.gmra.mxu1 %vm259_vm0, %v465_v63 }
 0x12e   : > { %1524 = vrot.lane.b32.xlu1 %v3242_v14, %s3019_s23  ;;  %1119 = vmatprep.subr.mxu1 %v1058_v40 }
 0x12f   : > { %1791 = vrot.lane.b32.xlu0 %v3316_v23, %s3020_s25  ;;  %1377 = vmatpush1.msra.mxu0 %v1318_v39 }
 0x130   : > { %v1294_v35 = vpop.permute.xlu1 %1293  ;;  %v1033_v38 = vpop.permute.xlu0 %1032  ;;  %2714 = vmatmul.mubr.msk.f32.gmra.mxu0 %vm259_vm0, %v729_v37  ;;  %1165 = vmatprep.mubr.f32.mxu1 %v3015_v19 }
 0x131   : > { %v1057_v27 = vsel %vm1044_vm3, %v1033_v38, %v1035_v59  ;;  %932 = vmatprep.mubr.f32.mxu0 %v3015_v19 }
 0x132   : > { %1787 = vrot.lane.b32.xlu1 %v3237_v13, %s3020_s25  ;;  %1120 = vmatpush1.msra.mxu1 %v1057_v27 }
 0x133   : > { %1526 = vrot.lane.b32.xlu0 %v3331_v24, %s3019_s23 }
 0x134   : > { %v1029_v33 = vpop.permute.xlu1 %1028  ;;  %v1296_v34 = vpop.permute.xlu0 %1295  ;;  %2715 = vmatmul.mubr.msk.f32.gmra.mxu0 %vm259_vm0, %v730_v28 }
 0x135   : > { %v1317_v36 = vsel %vm1303_vm4, %v1294_v35, %v1296_v34  ;;  %938 = vmatprep.mubr.f32.mxu0 %v3015_v19 }
 0x136   : > { %1783 = vrot.lane.b32.xlu1 %v3242_v14, %s3020_s25  ;;  %1378 = vmatprep.subr.mxu0 %v1317_v36 }
 0x137   : > { %1522 = vrot.lane.b32.xlu0 %v3253_v15, %s3019_s23 }
 0x138   : > { %v1292_v13 = vpop.permute.xlu1 %1291  ;;  %v1031_v30 = vpop.permute.xlu0 %1030  ;;  %2716 = vmatmul.mubr.msk.f32.gmra.mxu0 %vm259_vm0, %v731_v29 }
 0x139   : > { %v1316_v31 = vsel %vm1303_vm4, %v1292_v13, %v1294_v35  ;;  %v1056_v32 = vsel %vm1044_vm3, %v1029_v33, %v1031_v30  ;;  %944 = vmatprep.mubr.f32.mxu0 %v3015_v19 }
 0x13a   : > { %1518 = vrot.lane.b32.xlu1 %v3259_v17, %s3019_s23  ;;  %1121 = vmatprep.subr.mxu1 %v1056_v32 }
 0x13b   : > { %1785 = vrot.lane.b32.xlu0 %v3331_v24, %s3020_s25  ;;  %1379 = vmatpush1.msra.mxu0 %v1316_v31  ;;  %v988_v31 = vld [vmem:[#allocation5 + $0xc0] sm:$0xff] }
 0x13c   : > { %v1288_v14 = vpop.permute.xlu1 %1287  ;;  %v1027_v42 = vpop.permute.xlu0 %1026  ;;  %2717 = vmatmul.mubr.msk.f32.gmra.mxu0 %vm259_vm0, %v732_v41 }
 0x13d   : > { %v1055_v43 = vsel %vm1044_vm3, %v1027_v42, %v1029_v33  ;;  %1424 = vmatprep.mubr.f32.mxu0 %v3015_v19 }
 0x13e   : > { %1781 = vrot.lane.b32.xlu1 %v3253_v15, %s3020_s25  ;;  %1122 = vmatpush1.msra.mxu1 %v1055_v43  ;;  %v1247_v43 = vld [vmem:[#allocation5 + $0x100] sm:$0xff] }
 0x13f   : > { %1520 = vrot.lane.b32.xlu0 %v3346_v25, %s3019_s23 }
 0x140   : > { %v1023_v44 = vpop.permute.xlu1 %1022  ;;  %v1290_v45 = vpop.permute.xlu0 %1289 }
 0x141   : > { %v1315_v46 = vsel %vm1303_vm4, %v1288_v14, %v1290_v45 }
 0x142   : > { %1777 = vrot.lane.b32.xlu1 %v3259_v17, %s3020_s25  ;;  %1380 = vmatprep.subr.mxu0 %v1315_v46  ;;  %v990_v46 = vld [vmem:[#allocation5 + $0xd0] sm:$0xff] }
 0x143   : > { %1516 = vrot.lane.b32.xlu0 %v3264_v18, %s3019_s23 }
 0x144   : > { %v1286_v47 = vpop.permute.xlu1 %1285  ;;  %v1025_v48 = vpop.permute.xlu0 %1024 }
 0x145   : > { %v1314_v49 = vsel %vm1303_vm4, %v1286_v47, %v1288_v14  ;;  %v1054_v15 = vsel %vm1044_vm3, %v1023_v44, %v1025_v48  ;;  %v1248_v47 = vld [vmem:[#allocation5 + $0x108] sm:$0xff] }
 0x146   : > { %1512 = vrot.lane.b32.xlu1 %v3231_v11, %s3019_s23  ;;  %1123 = vmatprep.subr.mxu1 %v1054_v15  ;;  %v1249_v15 = vld [vmem:[#allocation5 + $0x110] sm:$0xff] }
 0x147   : > { %1779 = vrot.lane.b32.xlu0 %v3346_v25, %s3020_s25  ;;  %1381 = vmatpush1.msra.mxu0 %v1314_v49  ;;  %v991_v49 = vld [vmem:[#allocation5 + $0xd8] sm:$0xff] }
 0x148   : > { %v1282_v50 = vpop.permute.xlu1 %1281  ;;  %v1021_v17 = vpop.permute.xlu0 %1020 }
 0x149   : > { %v1053_v51 = vsel %vm1044_vm3, %v1021_v17, %v1023_v44  ;;  %v989_v44 = vld [vmem:[#allocation5 + $0xc8] sm:$0xff] }
 0x14a   : > { %1775 = vrot.lane.b32.xlu1 %v3264_v18, %s3020_s25  ;;  %1124 = vmatpush1.msra.mxu1 %v1053_v51  ;;  %v992_v51 = vld [vmem:[#allocation5 + $0xe0] sm:$0xff] }
 0x14b   : > { %1514 = vrot.lane.b32.xlu0 %v3357_v26, %s3019_s23 }
 0x14c   : > { %v1017_v52 = vpop.permute.xlu1 %1016  ;;  %v1284_v53 = vpop.permute.xlu0 %1283 }
 0x14d   : > { %v1313_v54 = vsel %vm1303_vm4, %v1282_v50, %v1284_v53  ;;  %v2867_v53 = vld [vmem:[%s3167_s29 + $0x80] sm:$0xff] }
 0x14e   : > { %1771 = vrot.lane.b32.xlu1 %v3231_v11, %s3020_s25  ;;  %1382 = vmatprep.subr.mxu0 %v1313_v54 }
 0x14f   : > { %1510 = vrot.lane.b32.xlu0 %v3234_v12, %s3019_s23 }
 0x150   : > { %v1280_v25 = vpop.permute.xlu1 %1279  ;;  %v1019_v55 = vpop.permute.xlu0 %1018 }
 0x151   : > { %v1312_v56 = vsel %vm1303_vm4, %v1280_v25, %v1282_v50  ;;  %v1052_v18 = vsel %vm1044_vm3, %v1017_v52, %v1019_v55  ;;  %v2866_v50 = vld [vmem:[%s3167_s29 + $0x90] sm:$0xff]  ;;  %v2868_v25 = vld [vmem:[%s3167_s29 + $0x78] sm:$0xff] }
 0x152   : > { %1506 = vrot.lane.b32.xlu1 %v3209_v7, %s3019_s23  ;;  %1125 = vmatprep.subr.mxu1 %v1052_v18 }
 0x153   : > { %1773 = vrot.lane.b32.xlu0 %v3357_v26, %s3020_s25  ;;  %1383 = vmatpush1.msra.mxu0 %v1312_v56 }
 0x154   : > { %v1276_v57 = vpop.permute.xlu1 %1275  ;;  %v1015_v11 = vpop.permute.xlu0 %1014 }
 0x155   : > { %v1051_v58 = vsel %vm1044_vm3, %v1015_v11, %v1017_v52  ;;  %v1250_v52 = vld [vmem:[#allocation5 + $0x118] sm:$0xff]  ;;  %v1251_v11 = vld [vmem:[#allocation5 + $0x120] sm:$0xff] }
 0x156   : > { %1769 = vrot.lane.b32.xlu1 %v3234_v12, %s3020_s25  ;;  %1126 = vmatpush1.msra.mxu1 %v1051_v58  ;;  %v2869_v58 = vld [vmem:[%s3167_s29 + $0x68] sm:$0xff] }
 0x157   : > { %1508 = vrot.lane.b32.xlu0 %v3206_v6, %s3019_s23 }
 0x158   : > { %v1011_v59 = vpop.permute.xlu1 %1010  ;;  %v1278_v60 = vpop.permute.xlu0 %1277 }
 0x159   : > { %v1311_v61 = vsel %vm1303_vm4, %v1276_v57, %v1278_v60 }
 0x15a   : > { %1765 = vrot.lane.b32.xlu1 %v3209_v7, %s3020_s25  ;;  %1384 = vmatprep.subr.mxu0 %v1311_v61 }
 0x15b   : > { %1504 = vrot.lane.b32.xlu0 %v3188_v2, %s3019_s23 }
 0x15c   : > { %v1274_v26 = vpop.permute.xlu1 %1273  ;;  %v1013_v62 = vpop.permute.xlu0 %1012 }
 0x15d   : > { %v1310_v63 = vsel %vm1303_vm4, %v1274_v26, %v1276_v57  ;;  %v1050_v12 = vsel %vm1044_vm3, %v1011_v59, %v1013_v62  ;;  %v993_v57 = vld [vmem:[#allocation5 + $0xe8] sm:$0xff]  ;;  %v994_v26 = vld [vmem:[#allocation5 + $0xf0] sm:$0xff] }
 0x15e   : > { %1500 = vrot.lane.b32.xlu1 %v3191_v3, %s3019_s23  ;;  %1127 = vmatprep.subr.mxu1 %v1050_v12  ;;  %v1252_v62 = vld [vmem:[#allocation5 + $0x128] sm:$0xff] }
 0x15f   : > { %1767 = vrot.lane.b32.xlu0 %v3206_v6, %s3020_s25  ;;  %1385 = vmatpush1.msra.mxu0 %v1310_v63 }
 0x160   : > { %v1270_v20 = vpop.permute.xlu1 %1269  ;;  %v1009_v7 = vpop.permute.xlu0 %1008 }
 0x161   : > { %v1049_v21 = vsel %vm1044_vm3, %v1009_v7, %v1011_v59  ;;  %v1253_v7 = vld [vmem:[#allocation5 + $0x130] sm:$0xff] }
 0x162   : > { %1763 = vrot.lane.b32.xlu1 %v3188_v2, %s3020_s25  ;;  %1128 = vmatpush1.msra.mxu1 %v1049_v21 }
 0x163   : > { %1502 = vrot.lane.b32.xlu0 %v3178_v0, %s3019_s23 }
 0x164   : > { %v1005_v39 = vpop.permute.xlu1 %1004  ;;  %v1272_v40 = vpop.permute.xlu0 %1271 }
 0x165   : > { %v1309_v37 = vsel %vm1303_vm4, %v1270_v20, %v1272_v40 }
 0x166   : > { %1759 = vrot.lane.b32.xlu1 %v3191_v3, %s3020_s25  ;;  %1386 = vmatprep.subr.mxu0 %v1309_v37 }
 0x167   : > { %1498 = vrot.lane.b32.xlu0 %v3181_v1, %s3019_s23 }
 0x168   : > { %v1268_v6 = vpop.permute.xlu1 %1267  ;;  %v1007_v35 = vpop.permute.xlu0 %1006 }
 0x169   : > { %v1308_v38 = vsel %vm1303_vm4, %v1268_v6, %v1270_v20  ;;  %v1048_v2 = vsel %vm1044_vm3, %v1005_v39, %v1007_v35  ;;  %v995_v20 = vld [vmem:[#allocation5 + $0xf8] sm:$0xff]  ;;  %v2871_v35 = vld [vmem:[%s3167_s29 + $0x50] sm:$0xff] }
 0x16a   : > { %1757 = vrot.lane.b32.xlu1 %v3181_v1, %s3020_s25  ;;  %1129 = vmatprep.subr.mxu1 %v1048_v2  ;;  %v1254_v6 = vld [vmem:[#allocation5 + $0x138] sm:$0xff]  ;;  %v2872_v2 = vld [vmem:[%s3167_s29 + $0x70] sm:$0xff] }
 0x16b   : > { %1761 = vrot.lane.b32.xlu0 %v3178_v0, %s3020_s25  ;;  %1387 = vmatpush1.msra.mxu0 %v1308_v38 }
 0x16c   : > { %v1264_v27 = vpop.permute.xlu1 %1263  ;;  %v1003_v3 = vpop.permute.xlu0 %1002 }
 0x16d   : > { %v1047_v28 = vsel %vm1044_vm3, %v1003_v3, %v1005_v39 }
 0x16e   : > { %2062 = vrot.lane.b32.xlu1 %v3256_v16, %s3021_s30  ;;  %1130 = vmatpush1.msra.mxu1 %v1047_v28 }
 0x16f   : > { %2060 = vrot.lane.b32.xlu0 %v3194_v4, %s3021_s30 }
 0x170   : > { %v999_v33 = vpop.permute.xlu1 %998  ;;  %v1266_v34 = vpop.permute.xlu0 %1265 }
 0x171   : > { %v1307_v1 = vsel %vm1303_vm4, %v1264_v27, %v1266_v34 }
 0x172   : > { %2303 = vrot.lane.b32.xlu1 %v3194_v4, %s3022_s4  ;;  %1388 = vmatprep.subr.mxu0 %v1307_v1 }
 0x173   : > { %2058 = vrot.lane.b32.xlu0 %v3203_v5, %s3021_s30 }
 0x174   : > { %v1262_v0 = vpop.permute.xlu1 %1261  ;;  %v1001_v36 = vpop.permute.xlu0 %1000 }
 0x175   : > { %v1306_v29 = vsel %vm1303_vm4, %v1262_v0, %v1264_v27  ;;  %v1046_v13 = vsel %vm1044_vm3, %v999_v33, %v1001_v36  ;;  %v2874_v36 = vld [vmem:[%s3167_s29 + $0x48] sm:$0xff] }
 0x176   : > { %2054 = vrot.lane.b32.xlu1 %v3212_v8, %s3021_s30  ;;  %1131 = vmatprep.subr.mxu1 %v1046_v13 }
 0x177   : > { %2305 = vrot.lane.b32.xlu0 %v3256_v16, %s3022_s4  ;;  %1389 = vmatpush1.msra.mxu0 %v1306_v29 }
 0x178   : > { %v1258_v30 = vpop.permute.xlu1 %1257  ;;  %v997_v4 = vpop.permute.xlu0 %996 }
 0x179   : > { %v1045_v32 = vsel %vm1044_vm3, %v997_v4, %v999_v33  ;;  %v2873_v33 = vld [vmem:[%s3167_s29 + $0x58] sm:$0xff] }
 0x17a   : > { %2301 = vrot.lane.b32.xlu1 %v3203_v5, %s3022_s4  ;;  %1132 = vmatpush1.msra.mxu1 %v1045_v32  ;;  %v2875_v4 = vld [vmem:[%s3167_s29 + $0x38] sm:$0xff] }
 0x17b   : > { %2056 = vrot.lane.b32.xlu0 %v3295_v22, %s3021_s30  ;;  %2718 = vmatmul.mubr.msk.f32.vlgmr.msra.gmra.mxu1 %vm259_vm0, %v988_v31 }
 0x17c   : > { %v1256_v41 = vpop.permute.xlu1 %1255  ;;  %v1260_v14 = vpop.permute.xlu0 %1259  ;;  %1171 = vmatprep.mubr.f32.mxu1 %v3015_v19 }
 0x17d   : > { %v1304_v16 = vsel %vm1303_vm4, %v1256_v41, %v1258_v30  ;;  %v1305_v42 = vsel %vm1303_vm4, %v1258_v30, %v1260_v14 }
 0x17e   : > { %2297 = vrot.lane.b32.xlu1 %v3212_v8, %s3022_s4  ;;  %1390 = vmatprep.subr.mxu0 %v1305_v42 }
 0x17f   : > { %2052 = vrot.lane.b32.xlu0 %v3217_v9, %s3021_s30  ;;  %1391 = vmatpush1.msra.mxu0 %v1304_v16  ;;  %v2876_v16 = vld [vmem:[%s3167_s29 + $0x40] sm:$0xff] }
 0x180   : > { %v1545_v5 = vpop.permute.xlu1 %1544  ;;  %2726 = vmatmul.mubr.msk.f32.vlgmr.msra.gmra.mxu0 %vm259_vm0, %v1247_v43  ;;  %2719 = vmatmul.mubr.msk.f32.gmra.mxu1 %vm259_vm0, %v989_v44 }
 0x181   : > { %v1543_v45 = vpop.permute.xlu0 %1542  ;;  %1177 = vmatprep.mubr.f32.mxu1 %v3015_v19  ;;  %1430 = vmatprep.mubr.f32.mxu0 %v3015_v19 }
 0x182   : > { %2048 = vrot.lane.b32.xlu1 %v3228_v10, %s3021_s30  ;;  %v1562_v8 = vsel %vm1546_vm5, %v1543_v45, %v1545_v5  ;;  %v2877_v5 = vld [vmem:[%s3167_s29 + $0x30] sm:$0xff] }
 0x183   : > { %2299 = vrot.lane.b32.xlu0 %v3295_v22, %s3022_s4  ;;  %1619 = vmatprep.subr.mxu1 %v1562_v8  ;;  %v2878_v8 = vld [vmem:[%s3167_s29 + $0x20] sm:$0xff] }
 0x184   : > { %v1802_v9 = vpop.permute.xlu1 %1801  ;;  %2720 = vmatmul.mubr.msk.f32.gmra.mxu1 %vm259_vm0, %v990_v46  ;;  %2727 = vmatmul.mubr.msk.f32.gmra.mxu0 %vm259_vm0, %v1248_v47 }
 0x185   : > { %v1541_v48 = vpop.permute.xlu0 %1540  ;;  %1183 = vmatprep.mubr.f32.mxu1 %v3015_v19  ;;  %1436 = vmatprep.mubr.f32.mxu0 %v3015_v19 }
 0x186   : > { %v1561_v10 = vsel %vm1546_vm5, %v1541_v48, %v1543_v45  ;;  %2295 = vrot.lane.b32.xlu1 %v2866_v50, %s3022_s4 }
 0x187   : > { %2050 = vrot.lane.b32.xlu0 %v3316_v23, %s3021_s30  ;;  %1620 = vmatpush1.msra.mxu1 %v1561_v10  ;;  %v2879_v10 = vld [vmem:[%s3167_s29 + $0x28] sm:$0xff] }
 0x188   : > { %v1537_v22 = vpop.permute.xlu1 %1536  ;;  %2721 = vmatmul.mubr.msk.f32.gmra.mxu1 %vm259_vm0, %v991_v49  ;;  %2728 = vmatmul.mubr.msk.f32.gmra.mxu0 %vm259_vm0, %v1249_v15 }
 0x189   : > { %v1804_v17 = vpop.permute.xlu0 %1803  ;;  %1189 = vmatprep.mubr.f32.mxu1 %v3015_v19  ;;  %1442 = vmatprep.mubr.f32.mxu0 %v3015_v19 }
 0x18a   : > { %2291 = vrot.lane.b32.xlu1 %v2867_v53, %s3022_s4  ;;  %v1821_v54 = vsel %vm1805_vm6, %v1802_v9, %v1804_v17 }
 0x18b   : > { %2046 = vrot.lane.b32.xlu0 %v2868_v25, %s3021_s30  ;;  %1878 = vmatprep.subr.mxu0 %v1821_v54 }
 0x18c   : > { %v1800_v55 = vpop.permute.xlu1 %1799  ;;  %2722 = vmatmul.mubr.msk.f32.gmra.mxu1 %vm259_vm0, %v992_v51  ;;  %2729 = vmatmul.mubr.msk.f32.gmra.mxu0 %vm259_vm0, %v1250_v52  ;;  %v2880_v51 = vld [vmem:[%s3167_s29 + $0x18] sm:$0xff] }
 0x18d   : > { %v1820_v56 = vsel %vm1805_vm6, %v1800_v55, %v1802_v9  ;;  %v1539_v18 = vpop.permute.xlu0 %1538  ;;  %1195 = vmatprep.mubr.f32.mxu1 %v3015_v19  ;;  %1448 = vmatprep.mubr.f32.mxu0 %v3015_v19 }
 0x18e   : > { %2042 = vrot.lane.b32.xlu1 %v2869_v58, %s3021_s30  ;;  %v1560_v59 = vsel %vm1546_vm5, %v1537_v22, %v1539_v18  ;;  %1879 = vmatpush1.msra.mxu0 %v1820_v56 }
 0x18f   : > { %2293 = vrot.lane.b32.xlu0 %v3316_v23, %s3022_s4  ;;  %1621 = vmatprep.subr.mxu1 %v1560_v59 }
 0x190   : > { %v1796_v60 = vpop.permute.xlu1 %1795  ;;  %2723 = vmatmul.mubr.msk.f32.gmra.mxu1 %vm259_vm0, %v993_v57  ;;  %2730 = vmatmul.mubr.msk.f32.gmra.mxu0 %vm259_vm0, %v1251_v11  ;;  %v2882_v11 = vld [vmem:[%s3167_s29 + $0x10] sm:$0xff] }
 0x191   : > { %v1535_v61 = vpop.permute.xlu0 %1534  ;;  %1201 = vmatprep.mubr.f32.mxu1 %v3015_v19  ;;  %1454 = vmatprep.mubr.f32.mxu0 %v3015_v19 }
 0x192   : > { %v1559_v63 = vsel %vm1546_vm5, %v1535_v61, %v1537_v22  ;;  %2289 = vrot.lane.b32.xlu1 %v2868_v25, %s3022_s4  ;;  %v2881_v25 = vld [vmem:[%s3167_s29 + $0x8] sm:$0xff]  ;;  %v2883_v61 = vld [vmem:[%s3167_s29] sm:$0xff] }
 0x193   : > { %2044 = vrot.lane.b32.xlu0 %v3331_v24, %s3021_s30  ;;  %1622 = vmatpush1.msra.mxu1 %v1559_v63  ;;  %v2870_v24 = vld [vmem:[%s3167_s29 + $0x60] sm:$0xff]  ;;  %s2942_s29 = sshll.u32 %s3024_s28, 4  ;;  %s2943_s29 = int_to_ptr.vmem [resolvable:$false] %s2942_s29 }
 0x194   : > { %v1531_v23 = vpop.permute.xlu1 %1530  ;;  %2724 = vmatmul.mubr.msk.f32.gmra.mxu1 %vm259_vm0, %v994_v26  ;;  %2731 = vmatmul.mubr.msk.f32.gmra.mxu0 %vm259_vm0, %v1252_v62  ;;  %s2944_s18 = scalar_lea.vmem %s2943_s29, 4096 }
 0x195   : > { %v1798_v12 = vpop.permute.xlu0 %1797  ;;  %1207 = vmatprep.mubr.f32.mxu1 %v3015_v19  ;;  %1460 = vmatprep.mubr.f32.mxu0 %v3015_v19 }
 0x196   : > { %2285 = vrot.lane.b32.xlu1 %v2869_v58, %s3022_s4  ;;  %v1819_v21 = vsel %vm1805_vm6, %v1796_v60, %v1798_v12  ;;  %v3845_v12 = vpop.f32.mrf.mxu1 }
 0x197   : > { %2040 = vrot.lane.b32.xlu0 %v2870_v24, %s3021_s30  ;;  %1880 = vmatprep.subr.mxu0 %v1819_v21 }
 0x198   : > { %v1794_v39 = vpop.permute.xlu1 %1793  ;;  %2725 = vmatmul.mubr.msk.f32.gmra.mxu1 %vm259_vm0, %v995_v20  ;;  %2732 = vmatmul.mubr.msk.f32.gmra.mxu0 %vm259_vm0, %v1253_v7 }
 0x199   : > { %v1818_v40 = vsel %vm1805_vm6, %v1794_v39, %v1796_v60  ;;  %v1533_v37 = vpop.permute.xlu0 %1532  ;;  %1667 = vmatprep.mubr.f32.mxu1 %v3015_v19  ;;  %1466 = vmatprep.mubr.f32.mxu0 %v3015_v19  ;;  %v3850_v39 = vpop.f32.mrf.mxu1 }
 0x19a   : > { %2036 = vrot.lane.b32.xlu1 %v2871_v35, %s3021_s30  ;;  %v1558_v38 = vsel %vm1546_vm5, %v1531_v23, %v1533_v37  ;;  %1881 = vmatpush1.msra.mxu0 %v1818_v40 }
 0x19b   : > { %2287 = vrot.lane.b32.xlu0 %v2872_v2, %s3022_s4  ;;  %1623 = vmatprep.subr.mxu1 %v1558_v38  ;;  %v3853_v37 = vpop.f32.mrf.mxu1  ;;  %v350_v38 = vpop.f32.mrf.mxu0 }
 0x19c   : > { %v1790_v27 = vpop.permute.xlu1 %1789  ;;  %2733 = vmatmul.mubr.msk.f32.gmra.mxu0 %vm259_vm0, %v1254_v6 }
 0x19d   : > { %v1529_v3 = vpop.permute.xlu0 %1528  ;;  %1926 = vmatprep.mubr.f32.mxu0 %v3015_v19 }
 0x19e   : > { %v1557_v28 = vsel %vm1546_vm5, %v1529_v3, %v1531_v23  ;;  %2283 = vrot.lane.b32.xlu1 %v2870_v24, %s3022_s4  ;;  %v204_v23 = vlaneseq }
 0x19f   : > { %2038 = vrot.lane.b32.xlu0 %v2873_v33, %s3021_s30  ;;  %1624 = vmatpush1.msra.mxu1 %v1557_v28 }
 0x1a0   : > { %v1525_v34 = vpop.permute.xlu1 %1524  ;;  %v205_v21 = vand.u32 127, %v204_v23 }
 0x1a1   : > { %v1792_v1 = vpop.permute.xlu0 %1791 }
 0x1a2   : > { %2279 = vrot.lane.b32.xlu1 %v2871_v35, %s3022_s4  ;;  %v1817_v0 = vsel %vm1805_vm6, %v1790_v27, %v1792_v1  ;;  %v206_v35 = vadd.s32 128, %v205_v21  ;;  %v211_v28 = vand.u32 15, %v205_v21 }
 0x1a3   : > { %2034 = vrot.lane.b32.xlu0 %v2874_v36, %s3021_s30  ;;  %1882 = vmatprep.subr.mxu0 %v1817_v0 }
 0x1a4   : > { %v1788_v29 = vpop.permute.xlu1 %1787  ;;  %v218_v0 = vand.u32 15, %v206_v35  ;;  %vm3864_vm7 = vcmp.ne.s32.totalorder %v211_v28, 0  ;;  %vm3895_vm9 = vcmp.ne.s32.totalorder %v211_v28, 15  ;;  %v2512_v28 = vld [vmem:[%s4563_s2 + $0x18] sm:$0xff] }
 0x1a5   : > { %v1816_v13 = vsel %vm1805_vm6, %v1788_v29, %v1790_v27  ;;  %v1527_v30 = vpop.permute.xlu0 %1526  ;;  %v3855_v27 = vpop.f32.mrf.mxu1 }
 0x1a6   : > { %2030 = vrot.lane.b32.xlu1 %v2875_v4, %s3021_s30  ;;  %v1556_v31 = vsel %vm1546_vm5, %v1525_v34, %v1527_v30  ;;  %1883 = vmatpush1.msra.mxu0 %v1816_v13  ;;  %vm3870_vm8 = vcmp.ne.s32.totalorder %v218_v0, 0  ;;  %vm3905_vm11 = vcmp.ne.s32.totalorder %v218_v0, 15 }
 0x1a7   : > { %2281 = vrot.lane.b32.xlu0 %v2873_v33, %s3022_s4  ;;  %1625 = vmatprep.subr.mxu1 %v1556_v31  ;;  %v352_v33 = vpop.f32.mrf.mxu0 }
 0x1a8   : > { %v1784_v32 = vpop.permute.xlu1 %1783 }
 0x1a9   : > { %v1523_v41 = vpop.permute.xlu0 %1522 }
 0x1aa   : > { %v1555_v14 = vsel %vm1546_vm5, %v1523_v41, %v1525_v34  ;;  %2277 = vrot.lane.b32.xlu1 %v2874_v36, %s3022_s4  ;;  %v3858_v34 = vpop.f32.mrf.mxu1  ;;  %v356_v36 = vpop.f32.mrf.mxu0 }
 0x1ab   : > { %2032 = vrot.lane.b32.xlu0 %v2876_v16, %s3021_s30  ;;  %1626 = vmatpush1.msra.mxu1 %v1555_v14 }
 0x1ac   : > { %v1519_v42 = vpop.permute.xlu1 %1518  ;;  %v3861_v30 = vpop.f32.mrf.mxu1 }
 0x1ad   : > { %v1786_v43 = vpop.permute.xlu0 %1785 }
 0x1ae   : > { %2273 = vrot.lane.b32.xlu1 %v2875_v4, %s3022_s4  ;;  %v1815_v44 = vsel %vm1805_vm6, %v1784_v32, %v1786_v43  ;;  %v3868_v41 = vpop.f32.mrf.mxu1 }
 0x1af   : > { %2028 = vrot.lane.b32.xlu0 %v2877_v5, %s3021_s30  ;;  %1884 = vmatprep.subr.mxu0 %v1815_v44  ;;  %v1490_v44 = vld [vmem:[#allocation5 + $0x140] sm:$0xff] }
 0x1b0   : > { %v1782_v45 = vpop.permute.xlu1 %1781 }
 0x1b1   : > { %v1814_v46 = vsel %vm1805_vm6, %v1782_v45, %v1784_v32  ;;  %v1521_v47 = vpop.permute.xlu0 %1520  ;;  %v358_v32 = vpop.f32.mrf.mxu0 }
 0x1b2   : > { %2024 = vrot.lane.b32.xlu1 %v2878_v8, %s3021_s30  ;;  %v1554_v9 = vsel %vm1546_vm5, %v1519_v42, %v1521_v47  ;;  %1885 = vmatpush1.msra.mxu0 %v1814_v46  ;;  %v3878_v45 = vpop.f32.mrf.mxu1 }
 0x1b3   : > { %2275 = vrot.lane.b32.xlu0 %v2876_v16, %s3022_s4  ;;  %1627 = vmatprep.subr.mxu1 %v1554_v9 }
 0x1b4   : > { %v1778_v48 = vpop.permute.xlu1 %1777 }
 0x1b5   : > { %v1517_v49 = vpop.permute.xlu0 %1516 }
 0x1b6   : > { %v1553_v15 = vsel %vm1546_vm5, %v1517_v49, %v1519_v42  ;;  %2271 = vrot.lane.b32.xlu1 %v2877_v5, %s3022_s4  ;;  %v3874_v42 = vpop.f32.mrf.mxu0  ;;  %v401_v5 = vsel %vm3864_vm7, %v350_v38, 0.0 }
 0x1b7   : > { %2026 = vrot.lane.b32.xlu0 %v2879_v10, %s3021_s30  ;;  %1628 = vmatpush1.msra.mxu1 %v1553_v15 }
 0x1b8   : > { %v1513_v50 = vpop.permute.xlu1 %1512  ;;  %v3881_v47 = vpop.f32.mrf.mxu0 }
 0x1b9   : > { %v1780_v22 = vpop.permute.xlu0 %1779  ;;  %v406_v38 = vsel %vm3870_vm8, %v3881_v47, 0.0 }
 0x1ba   : > { %2267 = vrot.lane.b32.xlu1 %v2878_v8, %s3022_s4  ;;  %v1813_v17 = vsel %vm1805_vm6, %v1778_v48, %v1780_v22  ;;  %v402_v8 = vsel %vm3870_vm8, %v352_v33, 0.0  ;;  %v3886_v15 = vpop.f32.mrf.mxu0  ;;  %v1491_v22 = vld [vmem:[#allocation5 + $0x148] sm:$0xff] }
 0x1bb   : > { %2022 = vrot.lane.b32.xlu0 %v2880_v51, %s3021_s30  ;;  %1886 = vmatprep.subr.mxu0 %v1813_v17  ;;  %v403_v17 = vsel %vm3864_vm7, %v356_v36, 0.0 }
 0x1bc   : > { %v1776_v52 = vpop.permute.xlu1 %1775 }
 0x1bd   : > { %v1812_v53 = vsel %vm1805_vm6, %v1776_v52, %v1778_v48  ;;  %v1515_v54 = vpop.permute.xlu0 %1514 }
 0x1be   : > { %2018 = vrot.lane.b32.xlu1 %v2881_v25, %s3021_s30  ;;  %v1552_v55 = vsel %vm1546_vm5, %v1513_v50, %v1515_v54  ;;  %1887 = vmatpush1.msra.mxu0 %v1812_v53  ;;  %v1749_v53 = vld [vmem:[#allocation5 + $0x180] sm:$0xff] }
 0x1bf   : > { %2269 = vrot.lane.b32.xlu0 %v2879_v10, %s3022_s4  ;;  %1629 = vmatprep.subr.mxu1 %v1552_v55 }
 0x1c0   : > { %v1772_v56 = vpop.permute.xlu1 %1771 }
 0x1c1   : > { %v1511_v18 = vpop.permute.xlu0 %1510 }
 0x1c2   : > { %v1551_v57 = vsel %vm1546_vm5, %v1511_v18, %v1513_v50  ;;  %2265 = vrot.lane.b32.xlu1 %v2880_v51, %s3022_s4 }
 0x1c3   : > { %2020 = vrot.lane.b32.xlu0 %v2882_v11, %s3021_s30  ;;  %1630 = vmatpush1.msra.mxu1 %v1551_v57  ;;  %v3023_v57 = vmov 0  }
 0x1c4   : > { %v1507_v58 = vpop.permute.xlu1 %1506  ;;  %2864 = vset.pattern.permute.xlu0 %v3023_v57  ;;  %2865 = vset.pattern.permute.xlu1 %v3023_v57 }
 0x1c5   : > { %v1774_v59 = vpop.permute.xlu0 %1773 }
 0x1c6   : > { %2261 = vrot.lane.b32.xlu1 %v2881_v25, %s3022_s4  ;;  %v1811_v60 = vsel %vm1805_vm6, %v1772_v56, %v1774_v59  ;;  %v3893_v25 = vpop.f32.mrf.mxu0 }
 0x1c7   : > { %2016 = vrot.lane.b32.xlu0 %v2883_v61, %s3021_s30  ;;  %1888 = vmatprep.subr.mxu0 %v1811_v60 }
 0x1c8   : > { %v1770_v26 = vpop.permute.xlu1 %1769 }
 0x1c9   : > { %v1810_v62 = vsel %vm1805_vm6, %v1770_v26, %v1772_v56  ;;  %v1509_v63 = vpop.permute.xlu0 %1508  ;;  %v404_v56 = vsel %vm3870_vm8, %v358_v32, 0.0 }
 0x1ca   : > { %2259 = vrot.lane.b32.xlu1 %v2883_v61, %s3022_s4  ;;  %v1550_v20 = vsel %vm1546_vm5, %v1507_v58, %v1509_v63  ;;  %1889 = vmatpush1.msra.mxu0 %v1810_v62  ;;  %v1492_v62 = vld [vmem:[#allocation5 + $0x150] sm:$0xff]  ;;  %v405_v63 = vsel %vm3864_vm7, %v3874_v42, 0.0 }
 0x1cb   : > { %2263 = vrot.lane.b32.xlu0 %v2882_v11, %s3022_s4  ;;  %1631 = vmatprep.subr.mxu1 %v1550_v20  ;;  %v2509_v11 = vld [vmem:[%s4563_s2] sm:$0xff]  ;;  %v2511_v42 = vld [vmem:[%s4563_s2 + $0x10] sm:$0xff]  ;;  %s2693_s4 = sshll.u32 %s3163_s26, 7 }
 0x1cc   : > { %v1766_v7 = vpop.permute.xlu1 %1765  ;;  %s4404_s7 = scalar_lea.vmem [#allocation7], %s2693_s4 }
 0x1cd   : > { %v1505_v24 = vpop.permute.xlu0 %1504  ;;  %s2603_s9 = sshll.u32 %s4404_s7, 4  ;;  %s4516_s9 = int_to_ptr.vmem [resolvable:$true] %s2603_s9 }
 0x1ce   : > { %v1549_v40 = vsel %vm1546_vm5, %v1505_v24, %v1507_v58  ;;  %v1750_v24 = vld [vmem:[#allocation5 + $0x188] sm:$0xff]  ;;  %s2938_s27 = scalar_lea.vmem %s4516_s9, 2048  ;;  %p2945_p10 = scmp.lt.s32.totalorder %s4516_s9, %s2943_s29 }
 0x1cf   : > { %1632 = vmatpush1.msra.mxu1 %v1549_v40  ;;  %2519 = vperm.xlu0 %2864, %v2509_v11   ;;  %p2939_p3 = scmp.ne.s32.totalorder %s4516_s9, %s2938_s27  ;;  %p2946_p2 = scmp.lt.s32.totalorder %s2944_s18, %s2938_s27 }
 0x1d0   : > { %v1501_v6 = vpop.permute.xlu1 %1500 }
 0x1d1   : > { %v1768_v2 = vpop.permute.xlu0 %1767  ;;  %v661_v9 = vpop.f32.mrf.mxu1  ;;  %p2940_p7 = pnand %p2939_p3, %p4632_p11  ;;  %p2947_p13 = por %p2946_p2, %p2945_p10 }
 0x1d2   : > { %v1809_v3 = vsel %vm1805_vm6, %v1766_v7, %v1768_v2  ;;  %v708_v49 = vadd.f32 %v661_v9, %v401_v5 }
 0x1d3   : > { %1890 = vmatprep.subr.mxu0 %v1809_v3  ;;  %v663_v51 = vpop.f32.mrf.mxu1  ;;  %2534 = vperm.xlu0 %2864, %v2512_v28   ;;  %p2941_p12 = pneg %p2940_p7 }
 0x1d4   : > { %v1764_v1 = vpop.permute.xlu1 %1763  ;;  %v709_v54 = vadd.f32 %v663_v51, %v402_v8  ;;  %v408_v8 = vsel %vm3870_vm8, %v3893_v25, 0.0  ;;  %v1494_v51 = vld [vmem:[#allocation5 + $0x160] sm:$0xff] }
 0x1d5   : > { %v1808_v29 = vsel %vm1805_vm6, %v1764_v1, %v1766_v7  ;;  %v1503_v13 = vpop.permute.xlu0 %1502  ;;  %v667_v18 = vpop.f32.mrf.mxu1  ;;  %v2510_v7 = vld [vmem:[%s4563_s2 + $0x8] sm:$0xff]  ;;  %v2513_v25 = vld [vmem:[%s4563_s2 + $0x20] sm:$0xff]  ;;  %p2948_p0 = pnand %p2947_p13, %p2941_p12 }
 0x1d6   : > { %v1548_v4 = vsel %vm1546_vm5, %v1501_v6, %v1503_v13  ;;  %1891 = vmatpush1.msra.mxu0 %v1808_v29  ;;  %v710_v59 = vadd.f32 %v667_v18, %v403_v17  ;;  %2524 = vperm.xlu1 %2865, %v2510_v7   ;;  %v1493_v13 = vld [vmem:[#allocation5 + $0x158] sm:$0xff] }
 0x1d7   : > { %1633 = vmatprep.subr.mxu1 %v1548_v4  ;;  %v669_v20 = vpop.f32.mrf.mxu1  ;;  %v407_v4 = vsel %vm3864_vm7, %v3886_v15, 0.0  ;;  %v1752_v18 = vld [vmem:[#allocation5 + $0x198] sm:$0xff] }
 0x1d8   : > { %v1760_v14 = vpop.permute.xlu1 %1759 }
 0x1d9   : > { %v1499_v43 = vpop.permute.xlu0 %1498  ;;  %v673_v3 = vpop.f32.mrf.mxu1 }
 0x1da   : > { %v1547_v46 = vsel %vm1546_vm5, %v1499_v43, %v1501_v6  ;;  %v711_v6 = vadd.f32 %v669_v20, %v404_v56  ;;  %v712_v0 = vadd.f32 %v673_v3, %v405_v63  ;;  %2529 = vperm.xlu1 %2865, %v2511_v42  }
 0x1db   : > { %1634 = vmatpush1.msra.mxu1 %v1547_v46 }
 0x1dc   : > { %2734 = vmatmul.mubr.msk.f32.vlgmr.msra.gmra.mxu1 %vm259_vm0, %v1490_v44  ;;  %v1758_v48 = vpop.permute.xlu1 %1757  ;;  %v1751_v44 = vld [vmem:[#allocation5 + $0x190] sm:$0xff] }
 0x1dd   : > { %v1806_v10 = vsel %vm1805_vm6, %v1758_v48, %v1760_v14  ;;  %v1762_v50 = vpop.permute.xlu0 %1761  ;;  %1673 = vmatprep.mubr.f32.mxu1 %v3015_v19 }
 0x1de   : > { %v1807_v52 = vsel %vm1805_vm6, %v1760_v14, %v1762_v50  ;;  %v675_v14 = vpop.f32.mrf.mxu1  ;;  %2539 = vperm.xlu1 %2865, %v2513_v25  }
 0x1df   : > { %1892 = vmatprep.subr.mxu0 %v1807_v52  ;;  %v713_v46 = vadd.f32 %v675_v14, %v406_v38  ;;  %v409_v52 = vsel %vm3864_vm7, %v3845_v12, 0.0  ;;  %v410_v12 = vsel %vm3870_vm8, %v3850_v39, 0.0  ;;  %v1495_v39 = vld [vmem:[#allocation5 + $0x168] sm:$0xff]  ;;  %v1753_v38 = vld [vmem:[#allocation5 + $0x1a0] sm:$0xff]  ;;  %v1496_v14 = vld [vmem:[#allocation5 + $0x170] sm:$0xff] }
 0x1e0   : > { %2735 = vmatmul.mubr.msk.f32.gmra.mxu1 %vm259_vm0, %v1491_v22  ;;  %1893 = vmatpush1.msra.mxu0 %v1806_v10  ;;  %v2063_v58 = vpop.permute.xlu1 %2062  ;;  %v904_v60 = vpop.f32.mrf.mxu0 }
 0x1e1   : > { %v2061_v26 = vpop.permute.xlu0 %2060  ;;  %2742 = vmatmul.mubr.msk.f32.vlgmr.msra.gmra.mxu0 %vm259_vm0, %v1749_v53  ;;  %1679 = vmatprep.mubr.f32.mxu1 %v3015_v19  ;;  %v955_v23 = vsel %vm3895_vm9, %v904_v60, 0.0  ;;  %v679_v48 = vpop.f32.mrf.mxu1 }
 0x1e2   : > { %v2080_v21 = vsel %vm2064_vm10, %v2061_v26, %v2063_v58  ;;  %1932 = vmatprep.mubr.f32.mxu0 %v3015_v19  ;;  %v3921_v40 = vadd.f32 %v955_v23, %v708_v49  ;;  %v906_v35 = vpop.f32.mrf.mxu0  ;;  %v2514_v49 = vld [vmem:[%s4563_s2 + $0x28] sm:$0xff]  ;;  %v714_v50 = vadd.f32 %v679_v48, %v407_v4  ;;  %v414_v48 = vsel %vm3870_vm8, %v3861_v30, 0.0 }
 0x1e3   : > { %2137 = vmatprep.subr.mxu1 %v2080_v21  ;;  %v956_v2 = vsel %vm3905_vm11, %v906_v35, 0.0  ;;  %2544 = vperm.xlu0 %2864, %v2514_v49   ;;  %v411_v21 = vsel %vm3864_vm7, %v3853_v37, 0.0  ;;  %v415_v30 = vsel %vm3864_vm7, %v3868_v41, 0.0 }
 0x1e4   : > { %2736 = vmatmul.mubr.msk.f32.gmra.mxu1 %vm259_vm0, %v1492_v62  ;;  %v2304_v33 = vpop.permute.xlu1 %2303  ;;  %v3932_v1 = vadd.f32 %v956_v2, %v709_v54  ;;  %v910_v36 = vpop.f32.mrf.mxu0 }
 0x1e5   : > { %v2059_v29 = vpop.permute.xlu0 %2058  ;;  %2743 = vmatmul.mubr.msk.f32.gmra.mxu0 %vm259_vm0, %v1750_v24  ;;  %1685 = vmatprep.mubr.f32.mxu1 %v3015_v19  ;;  %v957_v32 = vsel %vm3895_vm9, %v910_v36, 0.0  ;;  %v681_v54 = vpop.f32.mrf.mxu1 }
 0x1e6   : > { %v2079_v43 = vsel %vm2064_vm10, %v2059_v29, %v2061_v26  ;;  %1938 = vmatprep.mubr.f32.mxu0 %v3015_v19  ;;  %v3946_v5 = vadd.f32 %v957_v32, %v710_v59  ;;  %v912_v47 = vpop.f32.mrf.mxu0  ;;  %v715_v11 = vadd.f32 %v681_v54, %v408_v8 }
 0x1e7   : > { %2138 = vmatpush1.msra.mxu1 %v2079_v43  ;;  %v958_v9 = vsel %vm3905_vm11, %v912_v47, 0.0  ;;  %v685_v60 = vpop.f32.mrf.mxu1 }
 0x1e8   : > { %2737 = vmatmul.mubr.msk.f32.gmra.mxu1 %vm259_vm0, %v1493_v13  ;;  %v2055_v15 = vpop.permute.xlu1 %2054  ;;  %v3957_v10 = vadd.f32 %v958_v9, %v711_v6  ;;  %v916_v22 = vpop.f32.mrf.mxu0  ;;  %v716_v63 = vadd.f32 %v685_v60, %v409_v52  ;;  %v1497_v52 = vld [vmem:[#allocation5 + $0x178] sm:$0xff] }
 0x1e9   : > { %v2306_v17 = vpop.permute.xlu0 %2305  ;;  %2744 = vmatmul.mubr.msk.f32.gmra.mxu0 %vm259_vm0, %v1751_v44  ;;  %1691 = vmatprep.mubr.f32.mxu1 %v3015_v19  ;;  %v959_v53 = vsel %vm3895_vm9, %v916_v22, 0.0  ;;  %v687_v6 = vpop.f32.mrf.mxu1 }
 0x1ea   : > { %v2323_v56 = vsel %vm2307_vm12, %v2304_v33, %v2306_v17  ;;  %1944 = vmatprep.mubr.f32.mxu0 %v3015_v19  ;;  %v3971_v57 = vadd.f32 %v959_v53, %v712_v0  ;;  %v918_v58 = vpop.f32.mrf.mxu0  ;;  %v717_v3 = vadd.f32 %v687_v6, %v410_v12 }
 0x1eb   : > { %2380 = vmatprep.subr.mxu0 %v2323_v56  ;;  %v960_v59 = vsel %vm3905_vm11, %v918_v58, 0.0  ;;  %v691_v0 = vpop.f32.mrf.mxu1  ;;  %v1755_v56 = vld [vmem:[#allocation5 + $0x1b0] sm:$0xff] }
 0x1ec   : > { %2738 = vmatmul.mubr.msk.f32.gmra.mxu1 %vm259_vm0, %v1494_v51  ;;  %v2302_v26 = vpop.permute.xlu1 %2301  ;;  %v3979_v62 = vadd.f32 %v960_v59, %v713_v46  ;;  %v922_v23 = vpop.f32.mrf.mxu0  ;;  %v718_v13 = vadd.f32 %v691_v0, %v411_v21  ;;  %v1754_v46 = vld [vmem:[#allocation5 + $0x1a8] sm:$0xff]  ;;  %v1756_v21 = vld [vmem:[#allocation5 + $0x1b8] sm:$0xff] }
 0x1ed   : > { %v2322_v20 = vsel %vm2307_vm12, %v2302_v26, %v2304_v33  ;;  %v2057_v7 = vpop.permute.xlu0 %2056  ;;  %2745 = vmatmul.mubr.msk.f32.gmra.mxu0 %vm259_vm0, %v1752_v18  ;;  %1697 = vmatprep.mubr.f32.mxu1 %v3015_v19  ;;  %v961_v24 = vsel %vm3895_vm9, %v922_v23, 0.0  ;;  %v412_v33 = vsel %vm3870_vm8, %v3855_v27, 0.0  ;;  %v413_v27 = vsel %vm3864_vm7, %v3858_v34, 0.0  ;;  %v693_v43 = vpop.f32.mrf.mxu1 }
 0x1ee   : > { %v2078_v35 = vsel %vm2064_vm10, %v2055_v15, %v2057_v7  ;;  %2381 = vmatpush1.msra.mxu0 %v2322_v20  ;;  %1950 = vmatprep.mubr.f32.mxu0 %v3015_v19  ;;  %v3991_v2 = vadd.f32 %v961_v24, %v714_v50  ;;  %v924_v28 = vpop.f32.mrf.mxu0  ;;  %v719_v8 = vadd.f32 %v693_v43, %v412_v33 }
 0x1ef   : > { %2139 = vmatprep.subr.mxu1 %v2078_v35  ;;  %v962_v37 = vsel %vm3905_vm11, %v924_v28, 0.0  ;;  %v697_v49 = vpop.f32.mrf.mxu1 }
 0x1f0   : > { %2739 = vmatmul.mubr.msk.f32.gmra.mxu1 %vm259_vm0, %v1495_v39  ;;  %v2298_v36 = vpop.permute.xlu1 %2297  ;;  %v3999_v29 = vadd.f32 %v962_v37, %v715_v11  ;;  %v928_v4 = vpop.f32.mrf.mxu0  ;;  %v720_v22 = vadd.f32 %v697_v49, %v413_v27 }
 0x1f1   : > { %v2053_v32 = vpop.permute.xlu0 %2052  ;;  %2746 = vmatmul.mubr.msk.f32.gmra.mxu0 %vm259_vm0, %v1753_v38  ;;  %1703 = vmatprep.mubr.f32.mxu1 %v3015_v19  ;;  %v963_v42 = vsel %vm3895_vm9, %v928_v4, 0.0  ;;  %v699_v54 = vpop.f32.mrf.mxu1 }
 0x1f2   : > { %v2077_v44 = vsel %vm2064_vm10, %v2053_v32, %v2055_v15  ;;  %1956 = vmatprep.mubr.f32.mxu0 %v3015_v19  ;;  %v4010_v47 = vadd.f32 %v963_v42, %v716_v63  ;;  %v930_v9 = vpop.f32.mrf.mxu0  ;;  %v721_v11 = vadd.f32 %v699_v54, %v414_v48 }
 0x1f3   : > { %2140 = vmatpush1.msra.mxu1 %v2077_v44  ;;  %v964_v34 = vsel %vm3905_vm11, %v930_v9, 0.0  ;;  %v703_v59 = vpop.f32.mrf.mxu1 }
 0x1f4   : > { %2740 = vmatmul.mubr.msk.f32.gmra.mxu1 %vm259_vm0, %v1496_v14  ;;  %v2049_v50 = vpop.permute.xlu1 %2048  ;;  %v4018_v15 = vadd.f32 %v964_v34, %v717_v3  ;;  %v934_v17 = vpop.f32.mrf.mxu0  ;;  %v722_v26 = vadd.f32 %v703_v59, %v415_v30 }
 0x1f5   : > { %v2300_v51 = vpop.permute.xlu0 %2299  ;;  %2747 = vmatmul.mubr.msk.f32.gmra.mxu0 %vm259_vm0, %v1754_v46  ;;  %1709 = vmatprep.mubr.f32.mxu1 %v3015_v19  ;;  %v965_v53 = vsel %vm3895_vm9, %v934_v17, 0.0 }
 0x1f6   : > { %v2321_v25 = vsel %vm2307_vm12, %v2298_v36, %v2300_v51  ;;  %1962 = vmatprep.mubr.f32.mxu0 %v3015_v19  ;;  %v4029_v18 = vadd.f32 %v965_v53, %v718_v13  ;;  %v936_v58 = vpop.f32.mrf.mxu0 }
 0x1f7   : > { %2382 = vmatprep.subr.mxu0 %v2321_v25  ;;  %v966_v12 = vsel %vm3905_vm11, %v936_v58, 0.0 }
 0x1f8   : > { %2741 = vmatmul.mubr.msk.f32.gmra.mxu1 %vm259_vm0, %v1497_v52  ;;  %v2296_v41 = vpop.permute.xlu1 %2295  ;;  %v4034_v60 = vadd.f32 %v966_v12, %v719_v8  ;;  %v940_v63 = vpop.f32.mrf.mxu0 }
 0x1f9   : > { %v2320_v23 = vsel %vm2307_vm12, %v2296_v41, %v2298_v36  ;;  %v2051_v20 = vpop.permute.xlu0 %2050  ;;  %2748 = vmatmul.mubr.msk.f32.gmra.mxu0 %vm259_vm0, %v1755_v56  ;;  %2185 = vmatprep.mubr.f32.mxu1 %v3015_v19  ;;  %v967_v7 = vsel %vm3895_vm9, %v940_v63, 0.0  ;;  %v2515_v56 = vld [vmem:[%s4563_s2 + $0x30] sm:$0xff] }
 0x1fa   : > { %v2076_v39 = vsel %vm2064_vm10, %v2049_v50, %v2051_v20  ;;  %2383 = vmatpush1.msra.mxu0 %v2320_v23  ;;  %1968 = vmatprep.mubr.f32.mxu0 %v3015_v19  ;;  %v4043_v24 = vadd.f32 %v967_v7, %v720_v22  ;;  %v942_v6 = vpop.f32.mrf.mxu0 }
 0x1fb   : > { %2141 = vmatprep.subr.mxu1 %v2076_v39  ;;  %v968_v35 = vsel %vm3905_vm11, %v942_v6, 0.0  ;;  %2549 = vperm.xlu1 %2865, %v2515_v56   ;;  %v2255_v56 = vld [vmem:[#allocation5 + $0x220] sm:$0xff] }
 0x1fc   : > { %v2292_v38 = vpop.permute.xlu1 %2291  ;;  %v4047_v3 = vadd.f32 %v968_v35, %v721_v11  ;;  %v946_v28 = vpop.f32.mrf.mxu0  ;;  %v2516_v11 = vld [vmem:[%s4563_s2 + $0x38] sm:$0xff] }
 0x1fd   : > { %v2047_v33 = vpop.permute.xlu0 %2046  ;;  %2749 = vmatmul.mubr.msk.f32.gmra.mxu0 %vm259_vm0, %v1756_v21  ;;  %v969_v37 = vsel %vm3895_vm9, %v946_v28, 0.0  ;;  %2554 = vperm.xlu0 %2864, %v2516_v11   ;;  %v2014_v11 = vld [vmem:[#allocation5 + $0x1f0] sm:$0xff] }
 0x1fe   : > { %v2075_v0 = vsel %vm2064_vm10, %v2047_v33, %v2049_v50  ;;  %2428 = vmatprep.mubr.f32.mxu0 %v3015_v19  ;;  %v4054_v36 = vadd.f32 %v969_v37, %v722_v26 }
 0x1ff   : > { %2142 = vmatpush1.msra.mxu1 %v2075_v0 }
 0x200   : > { %4588 = vst [vmem:[#allocation11_spill] sm:$0xff] %v4054_v36  ;;  %v2043_v13 = vpop.permute.xlu1 %2042 }
 0x201   : > { %v2294_v4 = vpop.permute.xlu0 %2293 }
 0x202   : > { %v2319_v32 = vsel %vm2307_vm12, %v2292_v38, %v2294_v4 }
 0x203   : > { %2384 = vmatprep.subr.mxu0 %v2319_v32 }
 0x204   : > { %v2290_v14 = vpop.permute.xlu1 %2289 }
 0x205   : > { %v2318_v27 = vsel %vm2307_vm12, %v2290_v14, %v2292_v38  ;;  %v2045_v42 = vpop.permute.xlu0 %2044 }
 0x206   : > { %v2074_v43 = vsel %vm2064_vm10, %v2043_v13, %v2045_v42  ;;  %2385 = vmatpush1.msra.mxu0 %v2318_v27 }
 0x207   : > { %2143 = vmatprep.subr.mxu1 %v2074_v43 }
 0x208   : > { %v2286_v44 = vpop.permute.xlu1 %2285 }
 0x209   : > { %v2041_v46 = vpop.permute.xlu0 %2040 }
 0x20a   : > { %v2073_v8 = vsel %vm2064_vm10, %v2041_v46, %v2043_v13  ;;  %v2008_v46 = vld [vmem:[#allocation5 + $0x1c0] sm:$0xff] }
 0x20b   : > { %2144 = vmatpush1.msra.mxu1 %v2073_v8 }
 0x20c   : > { %v2037_v9 = vpop.permute.xlu1 %2036 }
 0x20d   : > { %v2288_v48 = vpop.permute.xlu0 %2287 }
 0x20e   : > { %v2317_v34 = vsel %vm2307_vm12, %v2286_v44, %v2288_v48 }
 0x20f   : > { %2386 = vmatprep.subr.mxu0 %v2317_v34 }
 0x210   : > { %v2284_v49 = vpop.permute.xlu1 %2283 }
 0x211   : > { %v2316_v50 = vsel %vm2307_vm12, %v2284_v49, %v2286_v44  ;;  %v2039_v22 = vpop.permute.xlu0 %2038  ;;  %v2009_v49 = vld [vmem:[#allocation5 + $0x1c8] sm:$0xff] }
 0x212   : > { %v2072_v17 = vsel %vm2064_vm10, %v2037_v9, %v2039_v22  ;;  %2387 = vmatpush1.msra.mxu0 %v2316_v50  ;;  %v2251_v22 = vld [vmem:[#allocation5 + $0x200] sm:$0xff] }
 0x213   : > { %2145 = vmatprep.subr.mxu1 %v2072_v17  ;;  %v2010_v17 = vld [vmem:[#allocation5 + $0x1d0] sm:$0xff] }
 0x214   : > { %v2280_v51 = vpop.permute.xlu1 %2279 }
 0x215   : > { %v2035_v52 = vpop.permute.xlu0 %2034 }
 0x216   : > { %v2071_v30 = vsel %vm2064_vm10, %v2035_v52, %v2037_v9  ;;  %v2011_v52 = vld [vmem:[#allocation5 + $0x1d8] sm:$0xff] }
 0x217   : > { %2146 = vmatpush1.msra.mxu1 %v2071_v30  ;;  %v2253_v30 = vld [vmem:[#allocation5 + $0x210] sm:$0xff] }
 0x218   : > { %v2031_v53 = vpop.permute.xlu1 %2030 }
 0x219   : > { %v2282_v54 = vpop.permute.xlu0 %2281 }
 0x21a   : > { %v2315_v25 = vsel %vm2307_vm12, %v2280_v51, %v2282_v54  ;;  %v2254_v54 = vld [vmem:[#allocation5 + $0x218] sm:$0xff] }
 0x21b   : > { %2388 = vmatprep.subr.mxu0 %v2315_v25  ;;  %v2013_v25 = vld [vmem:[#allocation5 + $0x1e8] sm:$0xff] }
 0x21c   : > { %v2278_v58 = vpop.permute.xlu1 %2277 }
 0x21d   : > { %v2314_v12 = vsel %vm2307_vm12, %v2278_v58, %v2280_v51  ;;  %v2033_v59 = vpop.permute.xlu0 %2032  ;;  %v2252_v51 = vld [vmem:[#allocation5 + $0x208] sm:$0xff] }
 0x21e   : > { %v2070_v41 = vsel %vm2064_vm10, %v2031_v53, %v2033_v59  ;;  %2389 = vmatpush1.msra.mxu0 %v2314_v12  ;;  %v2256_v58 = vld [vmem:[#allocation5 + $0x228] sm:$0xff]  ;;  %v2015_v12 = vld [vmem:[#allocation5 + $0x1f8] sm:$0xff]  ;;  %v2257_v59 = vld [vmem:[#allocation5 + $0x230] sm:$0xff] }
 0x21f   : > { %2147 = vmatprep.subr.mxu1 %v2070_v41  ;;  %v2258_v41 = vld [vmem:[#allocation5 + $0x238] sm:$0xff] }
 0x220   : > { %v2274_v26 = vpop.permute.xlu1 %2273 }
 0x221   : > { %v2029_v63 = vpop.permute.xlu0 %2028 }
 0x222   : > { %v2069_v23 = vsel %vm2064_vm10, %v2029_v63, %v2031_v53  ;;  %v2012_v53 = vld [vmem:[#allocation5 + $0x1e0] sm:$0xff] }
 0x223   : > { %2148 = vmatpush1.msra.mxu1 %v2069_v23  ;;  %v4118_v23 = vpop.f32.mrf.mxu0 }
 0x224   : > { %v2025_v20 = vpop.permute.xlu1 %2024 }
 0x225   : > { %v2276_v7 = vpop.permute.xlu0 %2275 }
 0x226   : > { %v2313_v39 = vsel %vm2307_vm12, %v2274_v26, %v2276_v7 }
 0x227   : > { %2390 = vmatprep.subr.mxu0 %v2313_v39 }
 0x228   : > { %v2272_v21 = vpop.permute.xlu1 %2271 }
 0x229   : > { %v2312_v6 = vsel %vm2307_vm12, %v2272_v21, %v2274_v26  ;;  %v2027_v35 = vpop.permute.xlu0 %2026  ;;  %v4114_v26 = vpop.f32.mrf.mxu1 }
 0x22a   : > { %v2068_v38 = vsel %vm2064_vm10, %v2025_v20, %v2027_v35  ;;  %2391 = vmatpush1.msra.mxu0 %v2312_v6 }
 0x22b   : > { %2149 = vmatprep.subr.mxu1 %v2068_v38 }
 0x22c   : > { %v2268_v28 = vpop.permute.xlu1 %2267 }
 0x22d   : > { %v2023_v33 = vpop.permute.xlu0 %2022 }
 0x22e   : > { %v2067_v37 = vsel %vm2064_vm10, %v2023_v33, %v2025_v20 }
 0x22f   : > { %2150 = vmatpush1.msra.mxu1 %v2067_v37 }
 0x230   : > { %v2019_v0 = vpop.permute.xlu1 %2018 }
 0x231   : > { %v2270_v13 = vpop.permute.xlu0 %2269 }
 0x232   : > { %v2311_v4 = vsel %vm2307_vm12, %v2268_v28, %v2270_v13 }
 0x233   : > { %2392 = vmatprep.subr.mxu0 %v2311_v4 }
 0x234   : > { %v2266_v32 = vpop.permute.xlu1 %2265 }
 0x235   : > { %v2310_v14 = vsel %vm2307_vm12, %v2266_v32, %v2268_v28  ;;  %v2021_v27 = vpop.permute.xlu0 %2020 }
 0x236   : > { %v2066_v42 = vsel %vm2064_vm10, %v2019_v0, %v2021_v27  ;;  %2393 = vmatpush1.msra.mxu0 %v2310_v14 }
 0x237   : > { %2151 = vmatprep.subr.mxu1 %v2066_v42 }
 0x238   : > { %v2262_v43 = vpop.permute.xlu1 %2261 }
 0x239   : > { %v2017_v44 = vpop.permute.xlu0 %2016 }
 0x23a   : > { %v2065_v8 = vsel %vm2064_vm10, %v2017_v44, %v2019_v0 }
 0x23b   : > { %2152 = vmatpush1.msra.mxu1 %v2065_v8  ;;  %v4116_v63 = vpop.f32.mrf.mxu1 }
 0x23c   : > { %2750 = vmatmul.mubr.msk.f32.vlgmr.msra.gmra.mxu1 %vm259_vm0, %v2008_v46  ;;  %v2260_v9 = vpop.permute.xlu1 %2259 }
 0x23d   : > { %v2308_v48 = vsel %vm2307_vm12, %v2260_v9, %v2262_v43  ;;  %v2264_v34 = vpop.permute.xlu0 %2263  ;;  %2191 = vmatprep.mubr.f32.mxu1 %v3015_v19  ;;  %v4120_v20 = vpop.f32.mrf.mxu1 }
 0x23e   : > { %v2309_v50 = vsel %vm2307_vm12, %v2262_v43, %v2264_v34 }
 0x23f   : > { %2394 = vmatprep.subr.mxu0 %v2309_v50 }
 0x240   : > { %2751 = vmatmul.mubr.msk.f32.gmra.mxu1 %vm259_vm0, %v2009_v49  ;;  %2395 = vmatpush1.msra.mxu0 %v2308_v48  ;;  %v4122_v7 = vpop.f32.mrf.mxu0  ;;  %v4124_v39 = vpop.f32.mrf.mxu1 }
 0x241   : > { %2758 = vmatmul.mubr.msk.f32.vlgmr.msra.gmra.mxu0 %vm259_vm0, %v2251_v22  ;;  %2197 = vmatprep.mubr.f32.mxu1 %v3015_v19 }
 0x242   : > { %2434 = vmatprep.mubr.f32.mxu0 %v3015_v19  ;;  %v4126_v21 = vpop.f32.mrf.mxu0  ;;  %v4128_v6 = vpop.f32.mrf.mxu1 }
 0x244   : > { %2752 = vmatmul.mubr.msk.f32.gmra.mxu1 %vm259_vm0, %v2010_v17  ;;  %v4132_v35 = vpop.f32.mrf.mxu1 }
 0x245   : > { %2759 = vmatmul.mubr.msk.f32.gmra.mxu0 %vm259_vm0, %v2252_v51  ;;  %2203 = vmatprep.mubr.f32.mxu1 %v3015_v19 }
 0x246   : > { %2440 = vmatprep.mubr.f32.mxu0 %v3015_v19  ;;  %v4136_v28 = vpop.f32.mrf.mxu1 }
 0x248   : > { %2753 = vmatmul.mubr.msk.f32.gmra.mxu1 %vm259_vm0, %v2011_v52  ;;  %v4140_v37 = vpop.f32.mrf.mxu1 }
 0x249   : > { %2760 = vmatmul.mubr.msk.f32.gmra.mxu0 %vm259_vm0, %v2253_v30  ;;  %2209 = vmatprep.mubr.f32.mxu1 %v3015_v19 }
 0x24a   : > { %2446 = vmatprep.mubr.f32.mxu0 %v3015_v19  ;;  %v4144_v13 = vpop.f32.mrf.mxu1 }
 0x24c   : > { %2754 = vmatmul.mubr.msk.f32.gmra.mxu1 %vm259_vm0, %v2012_v53  ;;  %v4148_v32 = vpop.f32.mrf.mxu1 }
 0x24d   : > { %2761 = vmatmul.mubr.msk.f32.gmra.mxu0 %vm259_vm0, %v2254_v54  ;;  %2215 = vmatprep.mubr.f32.mxu1 %v3015_v19 }
 0x24e   : > { %2452 = vmatprep.mubr.f32.mxu0 %v3015_v19  ;;  %v4152_v27 = vpop.f32.mrf.mxu1 }
 0x250   : > { %2755 = vmatmul.mubr.msk.f32.gmra.mxu1 %vm259_vm0, %v2013_v25  ;;  %v4156_v43 = vpop.f32.mrf.mxu1 }
 0x251   : > { %2762 = vmatmul.mubr.msk.f32.gmra.mxu0 %vm259_vm0, %v2255_v56  ;;  %2221 = vmatprep.mubr.f32.mxu1 %v3015_v19 }
 0x252   : > { %2458 = vmatprep.mubr.f32.mxu0 %v3015_v19  ;;  %v4160_v46 = vpop.f32.mrf.mxu1 }
 0x254   : > { %2756 = vmatmul.mubr.msk.f32.gmra.mxu1 %vm259_vm0, %v2014_v11  ;;  %v4164_v9 = vpop.f32.mrf.mxu1 }
 0x255   : > { %2763 = vmatmul.mubr.msk.f32.gmra.mxu0 %vm259_vm0, %v2256_v58  ;;  %2227 = vmatprep.mubr.f32.mxu1 %v3015_v19 }
 0x256   : > { %2464 = vmatprep.mubr.f32.mxu0 %v3015_v19  ;;  %v4168_v34 = vpop.f32.mrf.mxu1 }
 0x258   : > { %2757 = vmatmul.mubr.msk.f32.gmra.mxu1 %vm259_vm0, %v2015_v12  ;;  %v4172_v50 = vpop.f32.mrf.mxu1 }
 0x259   : > { %2764 = vmatmul.mubr.msk.f32.gmra.mxu0 %vm259_vm0, %v2257_v59 }
 0x25a   : > { %2470 = vmatprep.mubr.f32.mxu0 %v3015_v19  ;;  %v4130_v19 = vpop.f32.mrf.mxu0  ;;  %v4176_v17 = vpop.f32.mrf.mxu1 }
 0x25c   : > { %v4134_v38 = vpop.f32.mrf.mxu0 }
 0x25d   : > { %2765 = vmatmul.mubr.msk.f32.gmra.mxu0 %vm259_vm0, %v2258_v41 }
 0x25e   : > { %v4138_v33 = vpop.f32.mrf.mxu0 }
 0x260   : > { %v4142_v0 = vpop.f32.mrf.mxu0 }
 0x262   : > { %v4146_v4 = vpop.f32.mrf.mxu0 }
 0x264   : > { %v4150_v14 = vpop.f32.mrf.mxu0 }
 0x266   : > { %v4154_v42 = vpop.f32.mrf.mxu0 }
 0x268   : > { %v4158_v44 = vpop.f32.mrf.mxu0 }
 0x26a   : > { %v4162_v8 = vpop.f32.mrf.mxu0 }
 0x26c   : > { %v4166_v48 = vpop.f32.mrf.mxu0 }
 0x26e   : > { %v4170_v49 = vpop.f32.mrf.mxu0 }
 0x26f   : > { %4589 = vst [vmem:[#allocation12_spill] sm:$0xff] %v4170_v49 }
 0x270   : > { %v4174_v22 = vpop.f32.mrf.mxu0 }
 0x271   : > { %4590 = vst [vmem:[#allocation13_spill] sm:$0xff] %v4174_v22 }
 0x272   : > { %v4178_v51 = vpop.f32.mrf.mxu0 }
 0x273   : > { %4591 = vst [vmem:[#allocation14_spill] sm:$0xff] %v4178_v51 }
 0x274   : > { %v4182_v30 = vpop.f32.mrf.mxu0 }
 0x275   : > { %4592 = vst [vmem:[#allocation15_spill] sm:$0xff] %v4182_v30 }
 0x29c   : > { %v4180_v52 = vpop.f32.mrf.mxu1 }
 0x29e   : > { %v4184_v53 = vpop.f32.mrf.mxu1 }
 0x2a0   : > { %v4188_v25 = vpop.f32.mrf.mxu1 }
 0x2a1   : > { %v4186_v54 = vpop.f32.mrf.mxu0 }
 0x2a2   : > { %v4192_v11 = vpop.f32.mrf.mxu1 }
 0x2a3   : > { %v4190_v56 = vpop.f32.mrf.mxu0  ;;  %4594 = vst [vmem:[#allocation17_spill] sm:$0xff] %v4192_v11 }
 0x2a4   : > { %4593 = vst [vmem:[#allocation16_spill] sm:$0xff] %v4190_v56  ;;  %v4196_v12 = vpop.f32.mrf.mxu1 }
 0x2a5   : > { %v4194_v58 = vpop.f32.mrf.mxu0  ;;  %4596 = vst [vmem:[#allocation19_spill] sm:$0xff] %v4196_v12 }
 0x2a6   : > { %4595 = vst [vmem:[#allocation18_spill] sm:$0xff] %v4194_v58  ;;  %v4200_v41 = vpop.f32.mrf.mxu1 }
 0x2a7   : > { %v4198_v59 = vpop.f32.mrf.mxu0  ;;  %4598 = vst [vmem:[#allocation21_spill] sm:$0xff] %v4200_v41 }
 0x2a8   : > { %4597 = vst [vmem:[#allocation20_spill] sm:$0xff] %v4198_v59  ;;  %v4204_v30 = vpop.f32.mrf.mxu1 }
 0x2a9   : > { %v4202_v51 = vpop.f32.mrf.mxu0  ;;  %4600 = vst [vmem:[#allocation23_spill] sm:$0xff] %v4204_v30 }
 0x2aa   : > { %4599 = vst [vmem:[#allocation22_spill] sm:$0xff] %v4202_v51  ;;  %v4208_v49 = vpop.f32.mrf.mxu1 }
 0x2ab   : > { %v4206_v22 = vpop.f32.mrf.mxu0 }
 0x2ac   : > { %4601 = vst [vmem:[#allocation24_spill] sm:$0xff] %v4206_v22  ;;  %v4212_v56 = vpop.f32.mrf.mxu1 }
 0x2ad   : > { %v4210_v36 = vpop.f32.mrf.mxu0  ;;  %4603 = vst [vmem:[#allocation26_spill] sm:$0xff] %v4212_v56  ;;  %v416_v56 = vsel %vm3870_vm8, %v3878_v45, 0.0  ;;  %v1217_v45 = vsel %vm3870_vm8, %v4128_v6, 0.0 }
 0x2ae   : > { %4602 = vst [vmem:[#allocation25_spill] sm:$0xff] %v4210_v36  ;;  %v4216_v58 = vpop.f32.mrf.mxu1 }
 0x2af   : > { %v4214_v11 = vpop.f32.mrf.mxu0 }
 0x2b0   : > { %v4220_v59 = vpop.f32.mrf.mxu1 }
 0x2b1   : > { %v4218_v12 = vpop.f32.mrf.mxu0 }
 0x2b2   : > { %4604 = vst [vmem:[#allocation27_spill] sm:$0xff] %v4218_v12  ;;  %v4224_v51 = vpop.f32.mrf.mxu1  ;;  %v1214_v12 = vsel %vm3864_vm7, %v4116_v63, 0.0  ;;  %v1218_v63 = vsel %vm3864_vm7, %v4132_v35, 0.0  ;;  %v1222_v35 = vsel %vm3864_vm7, %v4148_v32, 0.0 }
 0x2b3   : > { %v4222_v41 = vpop.f32.mrf.mxu0  ;;  %4606 = vst [vmem:[#allocation29_spill] sm:$0xff] %v4224_v51 }
 0x2b4   : > { %4605 = vst [vmem:[#allocation28_spill] sm:$0xff] %v4222_v41  ;;  %v4228_v22 = vpop.f32.mrf.mxu1  ;;  %v1215_v41 = vsel %vm3870_vm8, %v4120_v20, 0.0  ;;  %v1219_v20 = vsel %vm3870_vm8, %v4136_v28, 0.0  ;;  %v970_v28 = vsel %vm3905_vm11, %v4118_v23, 0.0 }
 0x2b5   : > { %v4226_v30 = vpop.f32.mrf.mxu0  ;;  %4608 = vst [vmem:[#allocation31_spill] sm:$0xff] %v4228_v22  ;;  %v723_v22 = vadd.f32 %v4114_v26, %v416_v56  ;;  %v1220_v26 = vsel %vm3864_vm7, %v4140_v37, 0.0  ;;  %v1231_v6 = vadd.f32 %v1215_v41, %v3932_v1  ;;  %v1233_v37 = vadd.f32 %v1217_v45, %v3957_v10 }
 0x2b6   : > { %4607 = vst [vmem:[#allocation30_spill] sm:$0xff] %v4226_v30  ;;  %v1216_v30 = vsel %vm3864_vm7, %v4124_v39, 0.0  ;;  %v4248_v51 = vpop.f32.mrf.mxu1  ;;  %v1235_v1 = vadd.f32 %v1219_v20, %v3979_v62  ;;  %v1238_v41 = vadd.f32 %v1222_v35, %v4010_v47  ;;  %v1224_v10 = vsel %vm3864_vm7, %v4156_v43, 0.0  ;;  %v4613_v35 = vld [vmem:[#allocation11_spill] sm:$0xff] }
 0x2b7   : > { %v4233_v36 = vpop.f32.mrf.mxu0  ;;  %v1232_v56 = vadd.f32 %v1216_v30, %v3946_v5  ;;  %v1236_v5 = vadd.f32 %v1220_v26, %v3991_v2  ;;  %v986_v2 = vadd.f32 %v970_v28, %v723_v22  ;;  %v1226_v43 = vsel %vm3864_vm7, %v4164_v9, 0.0  ;;  %v4614_v28 = vld [vmem:[#allocation12_spill] sm:$0xff] }
 0x2b8   : > { %4609 = vst [vmem:[#allocation32_spill] sm:$0xff] %v4233_v36  ;;  %v1230_v36 = vadd.f32 %v1214_v12, %v3921_v40  ;;  %v1221_v40 = vsel %vm3870_vm8, %v4144_v13, 0.0  ;;  %v1234_v12 = vadd.f32 %v1218_v63, %v3971_v57  ;;  %v1223_v13 = vsel %vm3870_vm8, %v4152_v27, 0.0  ;;  %v4280_v30 = vpop.f32.mrf.mxu1 }
 0x2b9   : > { %v4260_v39 = vpop.f32.mrf.mxu0  ;;  %v1237_v32 = vadd.f32 %v1221_v40, %v3999_v29  ;;  %v1225_v57 = vsel %vm3870_vm8, %v4160_v46, 0.0  ;;  %v1474_v27 = vadd.f32 %v4126_v21, %v1231_v6  ;;  %v1475_v45 = vadd.f32 %v4130_v19, %v1232_v56  ;;  %v4611_v56 = vld [vmem:[#allocation17_spill] sm:$0xff] }
 0x2ba   : > { %v1473_v23 = vadd.f32 %v4122_v7, %v1230_v36  ;;  %v1476_v29 = vadd.f32 %v4134_v38, %v1233_v37  ;;  %v1239_v47 = vadd.f32 %v1223_v13, %v4018_v15  ;;  %v1227_v46 = vsel %vm3870_vm8, %v4168_v34, 0.0  ;;  %v4309_v19 = vpop.f32.mrf.mxu1 }
 0x2bb   : > { %v4290_v62 = vpop.f32.mrf.mxu0  ;;  %v1477_v22 = vadd.f32 %v4138_v33, %v1234_v12  ;;  %v1240_v36 = vadd.f32 %v1224_v10, %v4029_v18  ;;  %v1241_v7 = vadd.f32 %v1225_v57, %v4034_v60  ;;  %v1716_v21 = vsel %vm3895_vm9, %v4180_v52, 0.0  ;;  %v4615_v12 = vld [vmem:[#allocation13_spill] sm:$0xff]  ;;  %v4617_v57 = vld [vmem:[#allocation20_spill] sm:$0xff] }
 0x2bc   : > { %v1478_v15 = vadd.f32 %v4142_v0, %v1235_v1  ;;  %v4313_v38 = vadd.f32 %v4146_v4, %v1236_v5  ;;  %v4316_v9 = vadd.f32 %v4150_v14, %v1237_v32  ;;  %v4319_v33 = vadd.f32 %v4154_v42, %v1238_v41  ;;  %v4616_v41 = vld [vmem:[#allocation19_spill] sm:$0xff] }
 0x2bd   : > { %v4321_v18 = vpop.f32.mrf.mxu0  ;;  %v1242_v60 = vadd.f32 %v1226_v43, %v4043_v24  ;;  %v1243_v34 = vadd.f32 %v1227_v46, %v4047_v3  ;;  %v1717_v52 = vsel %vm3905_vm11, %v4184_v53, 0.0  ;;  %v1975_v0 = vsel %vm3864_vm7, %v4186_v54, 0.0  ;;  %v4610_v54 = vld [vmem:[#allocation16_spill] sm:$0xff] }
 0x2be   : > { %v4332_v14 = vadd.f32 %v4158_v44, %v1239_v47  ;;  %v1228_v42 = vsel %vm3864_vm7, %v4172_v50, 0.0  ;;  %v1732_v63 = vadd.f32 %v1716_v21, %v1473_v23  ;;  %v1718_v24 = vsel %vm3895_vm9, %v4188_v25, 0.0  ;;  %v4612_v25 = vld [vmem:[#allocation18_spill] sm:$0xff]  ;;  %v2520_v21 = vpop.permute.xlu0 %2519 }
 0x2bf   : > { %v4341_v3 = vadd.f32 %v4162_v8, %v1240_v36  ;;  %v4344_v53 = vadd.f32 %v4166_v48, %v1241_v7  ;;  %v1229_v44 = vsel %vm3870_vm8, %v4176_v17, 0.0  ;;  %v1976_v20 = vsel %vm3870_vm8, %v4610_v54, 0.0  ;;  %v4358_v40 = vpop.f32.mrf.mxu0 }
 0x2c0   : > { %v1733_v26 = vadd.f32 %v1717_v52, %v1474_v27  ;;  %v1991_v6 = vadd.f32 %v1975_v0, %v1732_v63  ;;  %v1719_v8 = vsel %vm3905_vm11, %v4611_v56, 0.0  ;;  %v1977_v48 = vsel %vm3864_vm7, %v4612_v25, 0.0  ;;  %v4619_v52 = vld [vmem:[#allocation22_spill] sm:$0xff] }
 0x2c1   : > { %v4361_v17 = vadd.f32 %v1228_v42, %v4613_v35  ;;  %v4364_v37 = vadd.f32 %v4614_v28, %v1242_v60  ;;  %v4367_v1 = vadd.f32 %v4615_v12, %v1243_v34  ;;  %v1734_v5 = vadd.f32 %v1718_v24, %v1475_v45  ;;  %v4618_v60 = vld [vmem:[#allocation21_spill] sm:$0xff] }
 0x2c2   : > { %v1992_v32 = vadd.f32 %v1976_v20, %v1733_v26  ;;  %v1720_v10 = vsel %vm3895_vm9, %v4616_v41, 0.0  ;;  %v1978_v23 = vsel %vm3870_vm8, %v4617_v57, 0.0  ;;  %v4376_v43 = vadd.f32 %v1229_v44, %v986_v2  ;;  %v2525_v26 = vpop.permute.xlu1 %2524 }
 0x2c3   : > { %v1735_v46 = vadd.f32 %v1719_v8, %v1476_v29  ;;  %v1993_v36 = vadd.f32 %v1977_v48, %v1734_v5  ;;  %v1721_v34 = vsel %vm3905_vm11, %v4618_v60, 0.0  ;;  %v1979_v0 = vsel %vm3864_vm7, %v4619_v52, 0.0  ;;  %v4620_v29 = vld [vmem:[#allocation23_spill] sm:$0xff] }
 0x2c4   : > { %v1736_v2 = vadd.f32 %v1720_v10, %v1477_v22  ;;  %v1722_v44 = vsel %vm3895_vm9, %v4620_v29, 0.0  ;;  %v1737_v22 = vadd.f32 %v1721_v34, %v1478_v15  ;;  %v1723_v28 = vsel %vm3905_vm11, %v4208_v49, 0.0 }
 0x2c5   : > { %v1994_v24 = vadd.f32 %v1978_v23, %v1735_v46  ;;  %v1738_v49 = vadd.f32 %v1722_v44, %v4313_v38  ;;  %v1739_v38 = vadd.f32 %v1723_v28, %v4316_v9  ;;  %v4626_v28 = vld [vmem:[#allocation29_spill] sm:$0xff] }
 0x2c6   : > { %v1995_v35 = vadd.f32 %v1979_v0, %v1736_v2  ;;  %v1725_v0 = vsel %vm3905_vm11, %v4216_v58, 0.0  ;;  %v4624_v2 = vld [vmem:[#allocation27_spill] sm:$0xff]  ;;  %v1726_v58 = vsel %vm3895_vm9, %v4220_v59, 0.0  ;;  %v1727_v59 = vsel %vm3905_vm11, %v4626_v28, 0.0 }
 0x2fc   : > { %v2187_v4 = vpop.f32.mrf.mxu1 }
 0x2fd   : > { %v2234_v27 = vadd.f32 %v2187_v4, %v1991_v6  ;;  %v4621_v6 = vld [vmem:[#allocation24_spill] sm:$0xff] }
 0x2fe   : > { %v2189_v50 = vpop.f32.mrf.mxu1  ;;  %v1980_v56 = vsel %vm3870_vm8, %v4621_v6, 0.0 }
 0x2ff   : > { %v2235_v4 = vadd.f32 %v2189_v50, %v1992_v32  ;;  %v4622_v32 = vld [vmem:[#allocation25_spill] sm:$0xff]  ;;  %v1996_v23 = vadd.f32 %v1980_v56, %v1737_v22 }
 0x300   : > { %v2193_v13 = vpop.f32.mrf.mxu1  ;;  %v1981_v41 = vsel %vm3864_vm7, %v4622_v32, 0.0  ;;  %v4627_v32 = vld [vmem:[#allocation30_spill] sm:$0xff] }
 0x301   : > { %v2430_v47 = vpop.f32.mrf.mxu0  ;;  %v2236_v8 = vadd.f32 %v2193_v13, %v1993_v36  ;;  %v1997_v52 = vadd.f32 %v1981_v41, %v1738_v49  ;;  %v1985_v41 = vsel %vm3864_vm7, %v4627_v32, 0.0 }
 0x302   : > { %v2477_v45 = vsel %vm3895_vm9, %v2430_v47, 0.0  ;;  %v2195_v7 = vpop.f32.mrf.mxu1 }
 0x303   : > { %v2493_v42 = vadd.f32 %v2477_v45, %v2234_v27  ;;  %v2432_v63 = vpop.f32.mrf.mxu0  ;;  %v2237_v10 = vadd.f32 %v2195_v7, %v1994_v24  ;;  %v4623_v27 = vld [vmem:[#allocation26_spill] sm:$0xff]  ;;  %v1982_v45 = vsel %vm3870_vm8, %v4214_v11, 0.0  ;;  %v1983_v11 = vsel %vm3864_vm7, %v4624_v2, 0.0 }
 0x304   : > { %v2478_v54 = vsel %vm3905_vm11, %v2432_v63, 0.0  ;;  %v2199_v20 = vpop.f32.mrf.mxu1  ;;  %v1724_v47 = vsel %vm3895_vm9, %v4623_v27, 0.0  ;;  %v2530_v63 = vpop.permute.xlu1 %2529 }
 0x305   : > { %v2494_v50 = vadd.f32 %v2478_v54, %v2235_v4  ;;  %v2557_v25 = vadd.f32 %v2520_v21, %v2493_v42  ;;  %v2436_v48 = vpop.f32.mrf.mxu0  ;;  %v2238_v7 = vadd.f32 %v2199_v20, %v1995_v35  ;;  %v1740_v54 = vadd.f32 %v1724_v47, %v4319_v33 }
 0x306   : > { %v2479_v12 = vsel %vm3895_vm9, %v2436_v48, 0.0  ;;  %v2201_v5 = vpop.f32.mrf.mxu1  ;;  %v1998_v20 = vadd.f32 %v1982_v45, %v1739_v38  ;;  %v1741_v33 = vadd.f32 %v1725_v0, %v4332_v14  ;;  %v1742_v14 = vadd.f32 %v1726_v58, %v4341_v3  ;;  %v4629_v45 = vld [vmem:[#allocation32_spill] sm:$0xff] }
 0x307   : > { %v2558_v57 = vadd.f32 %v2520_v21, %v2494_v50  ;;  %2573 = vst [vmem:[%s4404_s7] sm:$0xff] %v2557_v25  ;;  %v2495_v15 = vadd.f32 %v2479_v12, %v2236_v8  ;;  %v2438_v13 = vpop.f32.mrf.mxu0  ;;  %v2239_v24 = vadd.f32 %v2201_v5, %v1996_v23  ;;  %v4625_v8 = vld [vmem:[#allocation28_spill] sm:$0xff]  ;;  %v1999_v35 = vadd.f32 %v1983_v11, %v1740_v54  ;;  %v4628_v23 = vld [vmem:[#allocation31_spill] sm:$0xff] }
 0x308   : > { %v2480_v46 = vsel %vm3905_vm11, %v2438_v13, 0.0  ;;  %v2205_v36 = vpop.f32.mrf.mxu1  ;;  %v1984_v50 = vsel %vm3870_vm8, %v4625_v8, 0.0  ;;  %v1728_v27 = vsel %vm3895_vm9, %v4628_v23, 0.0  ;;  %v1743_v38 = vadd.f32 %v1727_v59, %v4344_v53  ;;  %v4630_v53 = vld [vmem:[#allocation14_spill] sm:$0xff] }
 0x309   : > { %2574 = vst [vmem:[%s4404_s7 + $0x8] sm:$0xff] %v2558_v57  ;;  %v2496_v21 = vadd.f32 %v2480_v46, %v2237_v10  ;;  %v2559_v60 = vadd.f32 %v2525_v26, %v2495_v15  ;;  %v2442_v34 = vpop.f32.mrf.mxu0  ;;  %v2000_v49 = vadd.f32 %v1984_v50, %v1741_v33  ;;  %v2535_v46 = vpop.permute.xlu0 %2534  ;;  %v1729_v0 = vsel %vm3905_vm11, %v4248_v51, 0.0 }
 0x30a   : > { %v2481_v4 = vsel %vm3895_vm9, %v2442_v34, 0.0  ;;  %v2207_v42 = vpop.f32.mrf.mxu1 }
 0x30b   : > { %v2560_v29 = vadd.f32 %v2525_v26, %v2496_v21  ;;  %2575 = vst [vmem:[%s4404_s7 + $0x10] sm:$0xff] %v2559_v60  ;;  %v2497_v44 = vadd.f32 %v2481_v4, %v2238_v7  ;;  %v2444_v9 = vpop.f32.mrf.mxu0  ;;  %v2240_v26 = vadd.f32 %v2205_v36, %v1997_v52  ;;  %v2241_v10 = vadd.f32 %v2207_v42, %v1998_v20  ;;  %v2540_v20 = vpop.permute.xlu1 %2539 }
 0x30c   : > { %v2482_v6 = vsel %vm3905_vm11, %v2444_v9, 0.0  ;;  %v2211_v56 = vpop.f32.mrf.mxu1  ;;  %v1986_v7 = vsel %vm3870_vm8, %v4629_v45, 0.0  ;;  %v2001_v52 = vadd.f32 %v1985_v41, %v1742_v14  ;;  %v1744_v9 = vadd.f32 %v1728_v27, %v4364_v37 }
 0x30d   : > { %2576 = vst [vmem:[%s4404_s7 + $0x18] sm:$0xff] %v2560_v29  ;;  %v2498_v25 = vadd.f32 %v2482_v6, %v2239_v24  ;;  %v2561_v48 = vadd.f32 %v2530_v63, %v2497_v44  ;;  %v2448_v22 = vpop.f32.mrf.mxu0  ;;  %v2242_v21 = vadd.f32 %v2211_v56, %v1999_v35  ;;  %v1487_v44 = vadd.f32 %v4630_v53, %v4361_v17 }
 0x30e   : > { %v2483_v12 = vsel %vm3895_vm9, %v2448_v22, 0.0  ;;  %v2213_v5 = vpop.f32.mrf.mxu1  ;;  %v2002_v51 = vadd.f32 %v1986_v7, %v1743_v38  ;;  %v1745_v17 = vadd.f32 %v1729_v0, %v4367_v1  ;;  %v1988_v37 = vsel %vm3870_vm8, %v4290_v62, 0.0  ;;  %v4631_v1 = vld [vmem:[#allocation15_spill] sm:$0xff] }
 0x30f   : > { %v2562_v57 = vadd.f32 %v2530_v63, %v2498_v25  ;;  %2577 = vst [vmem:[%s4404_s7 + $0x20] sm:$0xff] %v2561_v48  ;;  %v2499_v15 = vadd.f32 %v2483_v12, %v2240_v26  ;;  %v2450_v13 = vpop.f32.mrf.mxu0  ;;  %v1987_v63 = vsel %vm3864_vm7, %v4260_v39, 0.0  ;;  %v2243_v2 = vadd.f32 %v2213_v5, %v2000_v49  ;;  %v2545_v5 = vpop.permute.xlu0 %2544 }
 0x310   : > { %v2484_v47 = vsel %vm3905_vm11, %v2450_v13, 0.0  ;;  %v2217_v36 = vpop.f32.mrf.mxu1  ;;  %v1730_v39 = vsel %vm3895_vm9, %v4280_v30, 0.0  ;;  %v2003_v26 = vadd.f32 %v1987_v63, %v1744_v9  ;;  %v1731_v30 = vsel %vm3905_vm11, %v4309_v19, 0.0 }
 0x311   : > { %2578 = vst [vmem:[%s4404_s7 + $0x28] sm:$0xff] %v2562_v57  ;;  %v2500_v60 = vadd.f32 %v2484_v47, %v2241_v10  ;;  %v2563_v34 = vadd.f32 %v2535_v46, %v2499_v15  ;;  %v2454_v3 = vpop.f32.mrf.mxu0  ;;  %v2244_v6 = vadd.f32 %v2217_v36, %v2001_v52  ;;  %v1488_v59 = vadd.f32 %v4631_v1, %v4376_v43 }
 0x312   : > { %v2485_v4 = vsel %vm3895_vm9, %v2454_v3, 0.0  ;;  %v2219_v42 = vpop.f32.mrf.mxu1  ;;  %v1746_v12 = vadd.f32 %v1730_v39, %v1487_v44  ;;  %v1989_v62 = vsel %vm3864_vm7, %v4321_v18, 0.0  ;;  %v2004_v19 = vadd.f32 %v1988_v37, %v1745_v17 }
 0x313   : > { %v2564_v11 = vadd.f32 %v2535_v46, %v2500_v60  ;;  %2579 = vst [vmem:[%s4404_s7 + $0x30] sm:$0xff] %v2563_v34  ;;  %v2501_v24 = vadd.f32 %v2485_v4, %v2242_v21  ;;  %v2456_v29 = vpop.f32.mrf.mxu0  ;;  %v2245_v22 = vadd.f32 %v2219_v42, %v2002_v51  ;;  %v1747_v14 = vadd.f32 %v1731_v30, %v1488_v59  ;;  %v2550_v46 = vpop.permute.xlu1 %2549 }
 0x314   : > { %v2486_v54 = vsel %vm3905_vm11, %v2456_v29, 0.0  ;;  %v2223_v58 = vpop.f32.mrf.mxu1  ;;  %v1990_v43 = vsel %vm3870_vm8, %v4358_v40, 0.0  ;;  %v2005_v18 = vadd.f32 %v1989_v62, %v1746_v12  ;;  %v2555_v4 = vpop.permute.xlu0 %2554 }
 0x315   : > { %2580 = vst [vmem:[%s4404_s7 + $0x38] sm:$0xff] %v2564_v11  ;;  %v2502_v56 = vadd.f32 %v2486_v54, %v2243_v2  ;;  %v2565_v8 = vadd.f32 %v2540_v20, %v2501_v24  ;;  %v2460_v50 = vpop.f32.mrf.mxu0  ;;  %v2246_v10 = vadd.f32 %v2223_v58, %v2003_v26  ;;  %v2006_v7 = vadd.f32 %v1990_v43, %v1747_v14 }
 0x316   : > { %v2487_v25 = vsel %vm3895_vm9, %v2460_v50, 0.0  ;;  %v2225_v48 = vpop.f32.mrf.mxu1 }
 0x317   : > { %v2566_v33 = vadd.f32 %v2540_v20, %v2502_v56  ;;  %2581 = vst [vmem:[%s4404_s7 + $0x40] sm:$0xff] %v2565_v8  ;;  %v2503_v35 = vadd.f32 %v2487_v25, %v2244_v6  ;;  %v2462_v28 = vpop.f32.mrf.mxu0  ;;  %v2247_v49 = vadd.f32 %v2225_v48, %v2004_v19 }
 0x318   : > { %v2488_v32 = vsel %vm3905_vm11, %v2462_v28, 0.0  ;;  %v2229_v41 = vpop.f32.mrf.mxu1 }
 0x319   : > { %2582 = vst [vmem:[%s4404_s7 + $0x48] sm:$0xff] %v2566_v33  ;;  %v2567_v57 = vadd.f32 %v2545_v5, %v2503_v35  ;;  %v2504_v15 = vadd.f32 %v2488_v32, %v2245_v22  ;;  %v2466_v13 = vpop.f32.mrf.mxu0  ;;  %v2248_v16 = vadd.f32 %v2229_v41, %v2005_v18 }
 0x31a   : > { %v2489_v31 = vsel %vm3895_vm9, %v2466_v13, 0.0  ;;  %v2231_v36 = vpop.f32.mrf.mxu1 }
 0x31b   : > { %2583 = vst [vmem:[%s4404_s7 + $0x50] sm:$0xff] %v2567_v57  ;;  %v2568_v23 = vadd.f32 %v2545_v5, %v2504_v15  ;;  %v2505_v27 = vadd.f32 %v2489_v31, %v2246_v10  ;;  %v2468_v47 = vpop.f32.mrf.mxu0  ;;  %v2249_v3 = vadd.f32 %v2231_v36, %v2006_v7 }
 0x31c   : > { %v2490_v45 = vsel %vm3905_vm11, %v2468_v47, 0.0 }
 0x31d   : > { %2584 = vst [vmem:[%s4404_s7 + $0x58] sm:$0xff] %v2568_v23  ;;  %v2569_v40 = vadd.f32 %v2550_v46, %v2505_v27  ;;  %v2506_v21 = vadd.f32 %v2490_v45, %v2247_v49  ;;  %v2472_v60 = vpop.f32.mrf.mxu0 }
 0x31e   : > { %v2491_v34 = vsel %vm3895_vm9, %v2472_v60, 0.0 }
 0x31f   : > { %2585 = vst [vmem:[%s4404_s7 + $0x60] sm:$0xff] %v2569_v40  ;;  %v2570_v38 = vadd.f32 %v2550_v46, %v2506_v21  ;;  %v2507_v52 = vadd.f32 %v2491_v34, %v2248_v16  ;;  %v2474_v0 = vpop.f32.mrf.mxu0 }
 0x320   : > { %v2492_v42 = vsel %vm3905_vm11, %v2474_v0, 0.0 }
 0x321   : > { %2586 = vst [vmem:[%s4404_s7 + $0x68] sm:$0xff] %v2570_v38  ;;  %v2571_v63 = vadd.f32 %v2555_v4, %v2507_v52  ;;  %v2508_v2 = vadd.f32 %v2492_v42, %v2249_v3 }
 0x323   : > { %2587 = vst [vmem:[%s4404_s7 + $0x70] sm:$0xff] %v2571_v63  ;;  %v2572_v55 = vadd.f32 %v2555_v4, %v2508_v2 }
 0x325   : > { %2588 = vst [vmem:[%s4404_s7 + $0x78] sm:$0xff] %v2572_v55 }
 0x326   : > { %2951 = shalt.err (!%p2948_p0)
}
 0x327   : > { %s2952_s20 = scalar_lea.hbm %s4514_s22, 2048  ;;  %s2956_s23 = scalar_lea.hbm %s4564_s3, 4096 }
 0x328   : > { %p2953_p5 = scmp.ne.s32.totalorder %s4514_s22, %s2952_s20  ;;  %p2957_p4 = scmp.lt.s32.totalorder %s4514_s22, %s4564_s3 }
 0x329   : > { %p2958_p6 = scmp.lt.s32.totalorder %s2956_s23, %s2952_s20 }
 0x32a   : > { %p2954_p9 = pnand %p2953_p5, %p4632_p11 }
 0x32b   : > { %p2959_p8 = por %p2958_p6, %p2957_p4 }
 0x32c   : > { %p2955_p1 = pneg %p2954_p9 }
 0x32e   : > { %p2960_p3 = pnand %p2959_p8, %p2955_p1 }
 0x330   : > { %2963 = shalt.err (!%p2960_p3)
}
 0x331   : > { %s3025_s4 = smov 256   ;;  %s3026_s7 = smov 16  }
 0x332   : > { %2797 = dma.vmem_to_hbm [thread:$0]  (%p4632_p11), %s4516_s9, 2048, %s4514_s22, %s2590_s16, %s3025_s4, %s3025_s4, %s3026_s7  }
 0x333 PF: > { %s2618_s8 = sand.u32 1, %s2994_s12   ;;  %p4633_p7 = scmp.ne.s32.totalorder %s4570_s19, 0 }
 0x334   : > { %p4634_p12 = scmp.ge.s32.totalorder %s3006_s15, 2  ;;  %s2619_s10 = scalar_lea.sflag [#allocation4], %s2618_s8 }
 0x336   : > { %p2808_p10 = pnand %p4634_p12, %p4633_p7 }
 0x338   : > { %p2809_p2 = pneg %p2808_p10 }
 0x33a   : > { %2989 = dma.done.wait (%p2809_p2), %s2619_s10, 2048  }
 0x33b   : > { %2991 = vsyncadd (%p2809_p2), %s2619_s10, 4294965248  ;;  %p17_p13 = scmp.ge.s32.totalorder %s3101_s24, 4   ;;  %s4635_s12 = smov %s2998_s13 }
 0x33c   : > { %s4636_s13 = smov %s3002_s14  ;;  %s4637_s14 = smov %s3118_s5 }
 0x33d   : > { %s4638_s15 = smov %s3101_s24  ;;  %19 = sbr.rel (!%p17_p13) target bundleno = 6 (0x6), region = 89 }
 0x342   :  { %2624 = vsyncpa [#allocation3], 1 }
 0x343   :  { %2626 = vsyncpa [#allocation3 + $0x1], 1 }
 0x344   :  { %2627 = vsyncpa [#allocation6], 1 }
 0x345   :  { %2628 = vsyncpa [#allocation4], 1 }
 0x346   :  { %2630 = vsyncpa [#allocation4 + $0x1], 1 }

</bundles_post_ra>
